<compile_context>
chip_gen: v7x
topology: tpu7x:2x2x1
jax: 0.10.0
libtpu: 0.0.40
codegen_flags: <defaults>
</compile_context>

<pallas_src>
import numpy as np
import jax
import jax.numpy as jnp
from jax import lax
from jax.experimental import pallas as pl
from jax.experimental.pallas import tpu as pltpu


# ----------------------------- Pallas kernel ---------------------------------

def bilstm_kernel(x_ref, dmask_ref,
                  wx0_ref, whh0_ref, b0_ref,
                  wx1_ref, whh1_ref, b1_ref,
                  wlab_ref, blab_ref,
                  y_ref,
                  xw_ref, seq_ref):
    """x_ref: (T*B, E) time-major rows (row = t*B + b).
    dmask_ref: (1, 8H) float, 1.0 on forward-direction gate columns.
    wx*: (in_dim, 8H) fused fwd/bwd input-projection weights (gate-major columns).
    whh*: (2H, 8H) block-diagonal fused recurrent weights.
    b*: (1, 8H) fused biases (b_ih + b_hh, both directions).
    wlab: (1, 4H) label weight row; blab: (1, 1).
    Scratch: xw_ref (T*B, 8H) hoisted gate projections, seq_ref (T*B, 2H) layer-0 outputs.
    """
    TB = x_ref.shape[0]
    G = xw_ref.shape[-1]          # 8H
    H2 = seq_ref.shape[-1]        # 2H
    H = H2 // 2
    B = y_ref.shape[0]
    T = TB // B

    # Hoisted once: forward-column selector, materialized at full (B, 8H) so no
    # broadcast is re-emitted inside the loops.
    fwd_cols = jnp.broadcast_to(dmask_ref[...], (B, G)) > 0.5

    def run_layer(whh_bd, write_seq):
        """Fused fwd/bwd recurrence; whh_bd: (2H, 8H). Returns final h = [h_fwd | h_bwd]."""
        h = jnp.zeros((B, H2), jnp.float32)
        c = jnp.zeros((B, H2), jnp.float32)
        # Fully unrolled (T is a static Python int): all indices and slices are static.
        for i in range(T):
            tf = i                # timestep consumed by the forward chain
            tb = T - 1 - i        # timestep consumed by the backward chain
            gf = xw_ref[tf * B:(tf + 1) * B, :]                  # (B, 8H)
            gb = xw_ref[tb * B:(tb + 1) * B, :]                  # (B, 8H)
            gates = (jnp.where(fwd_cols, gf, gb)
                     + jnp.dot(h, whh_bd, preferred_element_type=jnp.float32))
            sg = jax.nn.sigmoid(gates)                           # full-tile EUP ops
            tg = jnp.tanh(gates)
            i_g = sg[:, 0 * H2:1 * H2]                           # contiguous 2H slices,
            f_g = sg[:, 1 * H2:2 * H2]                           # aligned with [fwd|bwd]
            g_g = tg[:, 2 * H2:3 * H2]                           # state layout
            o_g = sg[:, 3 * H2:4 * H2]
            c = f_g * c + i_g * g_g
            h = o_g * jnp.tanh(c)
            if write_seq:                                        # layer-0 outputs -> layer-1 input
                seq_ref[tf * B:(tf + 1) * B, 0:H] = h[:, 0:H]
                seq_ref[tb * B:(tb + 1) * B, H:H2] = h[:, H:H2]
        return h

    # ---- layer 0: hoisted input projection (one big matmul), fused recurrence ----
    xw_ref[...] = (jnp.dot(x_ref[...], wx0_ref[...], preferred_element_type=jnp.float32)
                   + b0_ref[...])
    h0 = run_layer(whh0_ref[...], write_seq=True)                # [h_n[0] | h_n[1]]

    # ---- layer 1: projection of the full layer-0 output sequence, fused recurrence ----
    xw_ref[...] = (jnp.dot(seq_ref[...], wx1_ref[...], preferred_element_type=jnp.float32)
                   + b1_ref[...])
    h1 = run_layer(whh1_ref[...], write_seq=False)               # [h_n[2] | h_n[3]]

    # ---- head: Linear(4H -> 1) on cat(h_n), as VPU multiply + lane reduction ----
    w = wlab_ref[...]                                            # (1, 4H)
    y_ref[...] = (jnp.sum(h0 * w[:, 0:H2], axis=-1, keepdims=True)
                  + jnp.sum(h1 * w[:, H2:2 * H2], axis=-1, keepdims=True)
                  + blab_ref[...])


# ------------------------------ wrapper ---------------------------------------

def _merge_gate_major(wf, wb, H):
    """Fuse per-direction (..., 4H) weights/biases (gate order i,f,g,o) into a single
    (..., 8H) gate-major layout: [i_f i_b | f_f f_b | g_f g_b | o_f o_b]."""
    parts = []
    for k in range(4):
        parts.append(wf[..., k * H:(k + 1) * H])
        parts.append(wb[..., k * H:(k + 1) * H])
    return jnp.concatenate(parts, axis=-1)


def _block_diag_hh(whf, whb, H):
    """Block-diagonal fused recurrent weight (2H, 8H): rows [0:H] (fwd state) feed only
    forward gate columns, rows [H:2H] (bwd state) feed only backward gate columns."""
    z = jnp.zeros((H, H), whf.dtype)
    top, bot = [], []
    for k in range(4):
        top += [whf[:, k * H:(k + 1) * H], z]
        bot += [z, whb[:, k * H:(k + 1) * H]]
    return jnp.concatenate(
        [jnp.concatenate(top, axis=-1), jnp.concatenate(bot, axis=-1)], axis=0)


def bilstm_forward(sents, lengths, params, hidden_dim):
    """Pallas forward of the PyTorch BiLSTM module (inference).  `lengths` is accepted
    for API parity but unused, exactly like the reference forward (no packing)."""
    del lengths
    H = hidden_dim
    # Glue (same as the PyTorch module): embedding lookup + seq-first transpose.
    x = params["embedding"][sents]                                 # (B, T, E)
    x = jnp.transpose(x, (1, 0, 2)).astype(jnp.float32)            # (T, B, E)
    T, B, E = x.shape
    x2 = x.reshape(T * B, E)                                       # time-major 2-D rows

    # Fused / permuted weights (gate-major columns, block-diagonal recurrent weights).
    wx0 = _merge_gate_major(params["wih_l0_f"], params["wih_l0_b"], H)    # (E, 8H)
    b0 = _merge_gate_major(params["b_l0_f"], params["b_l0_b"], H)         # (1, 8H)
    whh0 = _block_diag_hh(params["whh_l0_f"], params["whh_l0_b"], H)      # (2H, 8H)
    wx1 = _merge_gate_major(params["wih_l1_f"], params["wih_l1_b"], H)    # (2H, 8H)
    b1 = _merge_gate_major(params["b_l1_f"], params["b_l1_b"], H)         # (1, 8H)
    whh1 = _block_diag_hh(params["whh_l1_f"], params["whh_l1_b"], H)      # (2H, 8H)
    # Forward-column selector for the fused gate vector (1.0 on fwd columns).
    dmask = jnp.tile(
        jnp.concatenate([jnp.ones((1, H), jnp.float32),
                         jnp.zeros((1, H), jnp.float32)], axis=-1), (1, 4))  # (1, 8H)

    args = [x2, dmask, wx0, whh0, b0, wx1, whh1, b1,
            params["w_label"], params["b_label"]]
    vmem = pl.BlockSpec(memory_space=pltpu.MemorySpace.VMEM)
    return pl.pallas_call(
        bilstm_kernel,
        out_shape=jax.ShapeDtypeStruct((B, 1), jnp.float32),
        in_specs=[vmem] * len(args),
        out_specs=vmem,
        scratch_shapes=[pltpu.VMEM((T * B, 8 * H), jnp.float32),   # hoisted gate projections
                        pltpu.VMEM((T * B, 2 * H), jnp.float32)],  # layer-0 output sequence
    )(*args)


# --------------------------- pure-JAX reference --------------------------------

def _ref_lstm_dir(x, wih, whh, b, reverse):
    T, B, _ = x.shape
    H = whh.shape[0]

    def step(carry, x_t):
        h, c = carry
        g = x_t @ wih + h @ whh + b
        i_g = jax.nn.sigmoid(g[:, 0:H])
        f_g = jax.nn.sigmoid(g[:, H:2 * H])
        g_g = jnp.tanh(g[:, 2 * H:3 * H])
        o_g = jax.nn.sigmoid(g[:, 3 * H:4 * H])
        c = f_g * c + i_g * g_g
        h = o_g * jnp.tanh(c)
        return (h, c), h

    xs = x[::-1] if reverse else x
    h0 = jnp.zeros((B, H), jnp.float32)
    (h_final, _), hs = lax.scan(step, (h0, h0), xs)
    outs = hs[::-1] if reverse else hs
    return outs, h_final


def reference_forward(sents, lengths, params, H):
    del lengths   # unused by the PyTorch forward (no pack_padded_sequence)
    x = jnp.transpose(params["embedding"][sents], (1, 0, 2)).astype(jnp.float32)
    o0f, h0f = _ref_lstm_dir(x, params["wih_l0_f"], params["whh_l0_f"], params["b_l0_f"], False)
    o0b, h0b = _ref_lstm_dir(x, params["wih_l0_b"], params["whh_l0_b"], params["b_l0_b"], True)
    x1 = jnp.concatenate([o0f, o0b], axis=-1)
    _, h1f = _ref_lstm_dir(x1, params["wih_l1_f"], params["whh_l1_f"], params["b_l1_f"], False)
    _, h1b = _ref_lstm_dir(x1, params["wih_l1_b"], params["whh_l1_b"], params["b_l1_b"], True)
    # torch.cat([h_n[0], h_n[1], h_n[2], h_n[3]], dim=1) -> (B, 4H)
    feat = jnp.concatenate([h0f, h0b, h1f, h1b], axis=-1)
    return feat @ params["w_label"].T + params["b_label"]


# ------------------------------- main ------------------------------------------

if __name__ == "__main__":
    V, E, H, B, S = 20, 32, 32, 2, 8          # vocab, emb dim, hidden, batch, seq
    key = jax.random.PRNGKey(0)

    def nrm(k, shape):
        return (0.1 * jax.random.normal(k, shape)).astype(jnp.float32)

    keys = iter(jax.random.split(key, 32))
    params = {"embedding": nrm(next(keys), (V, E))}
    for lyr, in_dim in (("l0", E), ("l1", 2 * H)):
        for d in ("f", "b"):
            params[f"wih_{lyr}_{d}"] = nrm(next(keys), (in_dim, 4 * H))   # W_ih^T (i,f,g,o)
            params[f"whh_{lyr}_{d}"] = nrm(next(keys), (H, 4 * H))        # W_hh^T (i,f,g,o)
            params[f"b_{lyr}_{d}"] = nrm(next(keys), (1, 4 * H))          # b_ih + b_hh
    params["w_label"] = nrm(next(keys), (1, 4 * H))                       # hidden2label.weight
    params["b_label"] = nrm(next(keys), (1, 1))                           # hidden2label.bias

    sents = jax.random.randint(next(keys), (B, S), 1, V, dtype=jnp.int32)
    lengths = jnp.array([8, 5], dtype=jnp.int32)   # accepted for API parity; unused

    y = bilstm_forward(sents, lengths, params, H)
    jax.block_until_ready(y)

    y_ref = reference_forward(sents, lengths, params, H)
    np.testing.assert_allclose(np.asarray(y), np.asarray(y_ref), rtol=1e-4, atol=1e-4)

    print("KERNEL_OK")
</pallas_src>

<mosaic_0001>
module attributes {stable_mosaic.version = 11 : i64} {
  func.func @bilstm_kernel(%arg0: memref<16x32xf32, #tpu.memory_space<vmem>>, %arg1: memref<1x256xf32, #tpu.memory_space<vmem>>, %arg2: memref<32x256xf32, #tpu.memory_space<vmem>>, %arg3: memref<64x256xf32, #tpu.memory_space<vmem>>, %arg4: memref<1x256xf32, #tpu.memory_space<vmem>>, %arg5: memref<64x256xf32, #tpu.memory_space<vmem>>, %arg6: memref<64x256xf32, #tpu.memory_space<vmem>>, %arg7: memref<1x256xf32, #tpu.memory_space<vmem>>, %arg8: memref<1x128xf32, #tpu.memory_space<vmem>>, %arg9: memref<1x1xf32, #tpu.memory_space<vmem>>, %arg10: memref<2x1xf32, #tpu.memory_space<vmem>>, %arg11: memref<16x256xf32, #tpu.memory_space<vmem>>, %arg12: memref<16x64xf32, #tpu.memory_space<vmem>>) attributes {dimension_semantics = [], scalar_prefetch = 0 : i64, scratch_operands = 2 : i64, tpu.core_type = #tpu.core_type<tc>} {
    %c0 = arith.constant 0 : index
    %c0_0 = arith.constant 0 : index
    %0 = vector.load %arg1[%c0, %c0_0] : memref<1x256xf32, #tpu.memory_space<vmem>>, vector<1x256xf32>
    %1 = vector.shape_cast %0 : vector<1x256xf32> to vector<1x256xf32>
    %2 = vector.broadcast %1 : vector<1x256xf32> to vector<2x256xf32>
    %cst = arith.constant 5.000000e-01 : f32
    %3 = vector.broadcast %cst : f32 to vector<2x256xf32>
    %4 = arith.cmpf ogt, %2, %3 : vector<2x256xf32>
    %c0_1 = arith.constant 0 : index
    %c0_2 = arith.constant 0 : index
    %5 = vector.load %arg0[%c0_1, %c0_2] : memref<16x32xf32, #tpu.memory_space<vmem>>, vector<16x32xf32>
    %c0_3 = arith.constant 0 : index
    %c0_4 = arith.constant 0 : index
    %6 = vector.load %arg2[%c0_3, %c0_4] : memref<32x256xf32, #tpu.memory_space<vmem>>, vector<32x256xf32>
    %cst_5 = arith.constant dense<0.000000e+00> : vector<16x256xf32>
    %7 = tpu.matmul %5, %6, %cst_5 {dimension_numbers = #tpu.dot_dimension_numbers<[1], [0], [0], [1], [0, 0, 1, 1], [], []>} : vector<16x32xf32>, vector<32x256xf32>, vector<16x256xf32> -> vector<16x256xf32>
    %c0_6 = arith.constant 0 : index
    %c0_7 = arith.constant 0 : index
    %8 = vector.load %arg4[%c0_6, %c0_7] : memref<1x256xf32, #tpu.memory_space<vmem>>, vector<1x256xf32>
    %9 = vector.broadcast %8 : vector<1x256xf32> to vector<16x256xf32>
    %10 = arith.addf %7, %9 : vector<16x256xf32>
    %c0_8 = arith.constant 0 : index
    %c0_9 = arith.constant 0 : index
    %11 = vector.load %arg11[%c0_8, %c0_9] : memref<16x256xf32, #tpu.memory_space<vmem>>, vector<16x256xf32>
    tpu.vector_store %arg11[%c0_8, %c0_9], %10 {strides = array<i32>} : memref<16x256xf32, #tpu.memory_space<vmem>>, vector<16x256xf32>,
    %c0_10 = arith.constant 0 : index
    %c0_11 = arith.constant 0 : index
    %12 = vector.load %arg3[%c0_10, %c0_11] : memref<64x256xf32, #tpu.memory_space<vmem>>, vector<64x256xf32>
    %cst_12 = arith.constant 0.000000e+00 : f32
    %13 = vector.broadcast %cst_12 : f32 to vector<2x64xf32>
    %cst_13 = arith.constant 0.000000e+00 : f32
    %14 = vector.broadcast %cst_13 : f32 to vector<2x64xf32>
    %c0_14 = arith.constant 0 : index
    %c0_15 = arith.constant 0 : index
    %15 = vector.load %arg11[%c0_14, %c0_15] : memref<16x256xf32, #tpu.memory_space<vmem>>, vector<2x256xf32>
    %c14 = arith.constant 14 : index
    %c0_16 = arith.constant 0 : index
    %16 = vector.load %arg11[%c14, %c0_16] : memref<16x256xf32, #tpu.memory_space<vmem>>, vector<2x256xf32>
    %17 = arith.select %4, %15, %16 : vector<2x256xi1>, vector<2x256xf32>
    %cst_17 = arith.constant dense<0.000000e+00> : vector<2x256xf32>
    %18 = tpu.matmul %13, %12, %cst_17 {dimension_numbers = #tpu.dot_dimension_numbers<[1], [0], [0], [1], [0, 0, 1, 1], [], []>} : vector<2x64xf32>, vector<64x256xf32>, vector<2x256xf32> -> vector<2x256xf32>
    %19 = arith.addf %17, %18 : vector<2x256xf32>
    %20 = arith.negf %19 : vector<2x256xf32>
    %21 = math.exp %20 : vector<2x256xf32>
    %cst_18 = arith.constant 1.000000e+00 : f32
    %22 = vector.broadcast %cst_18 : f32 to vector<2x256xf32>
    %23 = arith.addf %22, %21 : vector<2x256xf32>
    %24 = arith.divf %22, %23 : vector<2x256xf32>
    %25 = math.tanh %19 : vector<2x256xf32>
    %26 = vector.extract_strided_slice %24 {offsets = [0, 0], sizes = [2, 64], strides = [1, 1]} : vector<2x256xf32> to vector<2x64xf32>
    %27 = vector.extract_strided_slice %24 {offsets = [0, 64], sizes = [2, 64], strides = [1, 1]} : vector<2x256xf32> to vector<2x64xf32>
    %28 = vector.extract_strided_slice %25 {offsets = [0, 128], sizes = [2, 64], strides = [1, 1]} : vector<2x256xf32> to vector<2x64xf32>
    %29 = vector.extract_strided_slice %24 {offsets = [0, 192], sizes = [2, 64], strides = [1, 1]} : vector<2x256xf32> to vector<2x64xf32>
    %30 = arith.mulf %27, %14 : vector<2x64xf32>
    %31 = arith.mulf %26, %28 : vector<2x64xf32>
    %32 = arith.addf %30, %31 : vector<2x64xf32>
    %33 = math.tanh %32 : vector<2x64xf32>
    %34 = arith.mulf %29, %33 : vector<2x64xf32>
    %35 = vector.extract_strided_slice %34 {offsets = [0, 0], sizes = [2, 32], strides = [1, 1]} : vector<2x64xf32> to vector<2x32xf32>
    %c0_19 = arith.constant 0 : index
    %c0_20 = arith.constant 0 : index
    %36 = vector.load %arg12[%c0_19, %c0_20] : memref<16x64xf32, #tpu.memory_space<vmem>>, vector<2x32xf32>
    tpu.vector_store %arg12[%c0_19, %c0_20], %35 {strides = array<i32>} : memref<16x64xf32, #tpu.memory_space<vmem>>, vector<2x32xf32>,
    %37 = vector.extract_strided_slice %34 {offsets = [0, 32], sizes = [2, 32], strides = [1, 1]} : vector<2x64xf32> to vector<2x32xf32>
    %c14_21 = arith.constant 14 : index
    %c32 = arith.constant 32 : index
    %38 = vector.load %arg12[%c14_21, %c32] : memref<16x64xf32, #tpu.memory_space<vmem>>, vector<2x32xf32>
    tpu.vector_store %arg12[%c14_21, %c32], %37 {strides = array<i32>} : memref<16x64xf32, #tpu.memory_space<vmem>>, vector<2x32xf32>,
    %c2 = arith.constant 2 : index
    %c0_22 = arith.constant 0 : index
    %39 = vector.load %arg11[%c2, %c0_22] : memref<16x256xf32, #tpu.memory_space<vmem>>, vector<2x256xf32>
    %c12 = arith.constant 12 : index
    %c0_23 = arith.constant 0 : index
    %40 = vector.load %arg11[%c12, %c0_23] : memref<16x256xf32, #tpu.memory_space<vmem>>, vector<2x256xf32>
    %41 = arith.select %4, %39, %40 : vector<2x256xi1>, vector<2x256xf32>
    %cst_24 = arith.constant dense<0.000000e+00> : vector<2x256xf32>
    %42 = tpu.matmul %34, %12, %cst_24 {dimension_numbers = #tpu.dot_dimension_numbers<[1], [0], [0], [1], [0, 0, 1, 1], [], []>} : vector<2x64xf32>, vector<64x256xf32>, vector<2x256xf32> -> vector<2x256xf32>
    %43 = arith.addf %41, %42 : vector<2x256xf32>
    %44 = arith.negf %43 : vector<2x256xf32>
    %45 = math.exp %44 : vector<2x256xf32>
    %cst_25 = arith.constant 1.000000e+00 : f32
    %46 = vector.broadcast %cst_25 : f32 to vector<2x256xf32>
    %47 = arith.addf %46, %45 : vector<2x256xf32>
    %48 = arith.divf %46, %47 : vector<2x256xf32>
    %49 = math.tanh %43 : vector<2x256xf32>
    %50 = vector.extract_strided_slice %48 {offsets = [0, 0], sizes = [2, 64], strides = [1, 1]} : vector<2x256xf32> to vector<2x64xf32>
    %51 = vector.extract_strided_slice %48 {offsets = [0, 64], sizes = [2, 64], strides = [1, 1]} : vector<2x256xf32> to vector<2x64xf32>
    %52 = vector.extract_strided_slice %49 {offsets = [0, 128], sizes = [2, 64], strides = [1, 1]} : vector<2x256xf32> to vector<2x64xf32>
    %53 = vector.extract_strided_slice %48 {offsets = [0, 192], sizes = [2, 64], strides = [1, 1]} : vector<2x256xf32> to vector<2x64xf32>
    %54 = arith.mulf %51, %32 : vector<2x64xf32>
    %55 = arith.mulf %50, %52 : vector<2x64xf32>
    %56 = arith.addf %54, %55 : vector<2x64xf32>
    %57 = math.tanh %56 : vector<2x64xf32>
    %58 = arith.mulf %53, %57 : vector<2x64xf32>
    %59 = vector.extract_strided_slice %58 {offsets = [0, 0], sizes = [2, 32], strides = [1, 1]} : vector<2x64xf32> to vector<2x32xf32>
    %c2_26 = arith.constant 2 : index
    %c0_27 = arith.constant 0 : index
    %60 = vector.load %arg12[%c2_26, %c0_27] : memref<16x64xf32, #tpu.memory_space<vmem>>, vector<2x32xf32>
    tpu.vector_store %arg12[%c2_26, %c0_27], %59 {strides = array<i32>} : memref<16x64xf32, #tpu.memory_space<vmem>>, vector<2x32xf32>,
    %61 = vector.extract_strided_slice %58 {offsets = [0, 32], sizes = [2, 32], strides = [1, 1]} : vector<2x64xf32> to vector<2x32xf32>
    %c12_28 = arith.constant 12 : index
    %c32_29 = arith.constant 32 : index
    %62 = vector.load %arg12[%c12_28, %c32_29] : memref<16x64xf32, #tpu.memory_space<vmem>>, vector<2x32xf32>
    tpu.vector_store %arg12[%c12_28, %c32_29], %61 {strides = array<i32>} : memref<16x64xf32, #tpu.memory_space<vmem>>, vector<2x32xf32>,
    %c4 = arith.constant 4 : index
    %c0_30 = arith.constant 0 : index
    %63 = vector.load %arg11[%c4, %c0_30] : memref<16x256xf32, #tpu.memory_space<vmem>>, vector<2x256xf32>
    %c10 = arith.constant 10 : index
    %c0_31 = arith.constant 0 : index
    %64 = vector.load %arg11[%c10, %c0_31] : memref<16x256xf32, #tpu.memory_space<vmem>>, vector<2x256xf32>
    %65 = arith.select %4, %63, %64 : vector<2x256xi1>, vector<2x256xf32>
    %cst_32 = arith.constant dense<0.000000e+00> : vector<2x256xf32>
    %66 = tpu.matmul %58, %12, %cst_32 {dimension_numbers = #tpu.dot_dimension_numbers<[1], [0], [0], [1], [0, 0, 1, 1], [], []>} : vector<2x64xf32>, vector<64x256xf32>, vector<2x256xf32> -> vector<2x256xf32>
    %67 = arith.addf %65, %66 : vector<2x256xf32>
    %68 = arith.negf %67 : vector<2x256xf32>
    %69 = math.exp %68 : vector<2x256xf32>
    %cst_33 = arith.constant 1.000000e+00 : f32
    %70 = vector.broadcast %cst_33 : f32 to vector<2x256xf32>
    %71 = arith.addf %70, %69 : vector<2x256xf32>
    %72 = arith.divf %70, %71 : vector<2x256xf32>
    %73 = math.tanh %67 : vector<2x256xf32>
    %74 = vector.extract_strided_slice %72 {offsets = [0, 0], sizes = [2, 64], strides = [1, 1]} : vector<2x256xf32> to vector<2x64xf32>
    %75 = vector.extract_strided_slice %72 {offsets = [0, 64], sizes = [2, 64], strides = [1, 1]} : vector<2x256xf32> to vector<2x64xf32>
    %76 = vector.extract_strided_slice %73 {offsets = [0, 128], sizes = [2, 64], strides = [1, 1]} : vector<2x256xf32> to vector<2x64xf32>
    %77 = vector.extract_strided_slice %72 {offsets = [0, 192], sizes = [2, 64], strides = [1, 1]} : vector<2x256xf32> to vector<2x64xf32>
    %78 = arith.mulf %75, %56 : vector<2x64xf32>
    %79 = arith.mulf %74, %76 : vector<2x64xf32>
    %80 = arith.addf %78, %79 : vector<2x64xf32>
    %81 = math.tanh %80 : vector<2x64xf32>
    %82 = arith.mulf %77, %81 : vector<2x64xf32>
    %83 = vector.extract_strided_slice %82 {offsets = [0, 0], sizes = [2, 32], strides = [1, 1]} : vector<2x64xf32> to vector<2x32xf32>
    %c4_34 = arith.constant 4 : index
    %c0_35 = arith.constant 0 : index
    %84 = vector.load %arg12[%c4_34, %c0_35] : memref<16x64xf32, #tpu.memory_space<vmem>>, vector<2x32xf32>
    tpu.vector_store %arg12[%c4_34, %c0_35], %83 {strides = array<i32>} : memref<16x64xf32, #tpu.memory_space<vmem>>, vector<2x32xf32>,
    %85 = vector.extract_strided_slice %82 {offsets = [0, 32], sizes = [2, 32], strides = [1, 1]} : vector<2x64xf32> to vector<2x32xf32>
    %c10_36 = arith.constant 10 : index
    %c32_37 = arith.constant 32 : index
    %86 = vector.load %arg12[%c10_36, %c32_37] : memref<16x64xf32, #tpu.memory_space<vmem>>, vector<2x32xf32>
    tpu.vector_store %arg12[%c10_36, %c32_37], %85 {strides = array<i32>} : memref<16x64xf32, #tpu.memory_space<vmem>>, vector<2x32xf32>,
    %c6 = arith.constant 6 : index
    %c0_38 = arith.constant 0 : index
    %87 = vector.load %arg11[%c6, %c0_38] : memref<16x256xf32, #tpu.memory_space<vmem>>, vector<2x256xf32>
    %c8 = arith.constant 8 : index
    %c0_39 = arith.constant 0 : index
    %88 = vector.load %arg11[%c8, %c0_39] : memref<16x256xf32, #tpu.memory_space<vmem>>, vector<2x256xf32>
    %89 = arith.select %4, %87, %88 : vector<2x256xi1>, vector<2x256xf32>
    %cst_40 = arith.constant dense<0.000000e+00> : vector<2x256xf32>
    %90 = tpu.matmul %82, %12, %cst_40 {dimension_numbers = #tpu.dot_dimension_numbers<[1], [0], [0], [1], [0, 0, 1, 1], [], []>} : vector<2x64xf32>, vector<64x256xf32>, vector<2x256xf32> -> vector<2x256xf32>
    %91 = arith.addf %89, %90 : vector<2x256xf32>
    %92 = arith.negf %91 : vector<2x256xf32>
    %93 = math.exp %92 : vector<2x256xf32>
    %cst_41 = arith.constant 1.000000e+00 : f32
    %94 = vector.broadcast %cst_41 : f32 to vector<2x256xf32>
    %95 = arith.addf %94, %93 : vector<2x256xf32>
    %96 = arith.divf %94, %95 : vector<2x256xf32>
    %97 = math.tanh %91 : vector<2x256xf32>
    %98 = vector.extract_strided_slice %96 {offsets = [0, 0], sizes = [2, 64], strides = [1, 1]} : vector<2x256xf32> to vector<2x64xf32>
    %99 = vector.extract_strided_slice %96 {offsets = [0, 64], sizes = [2, 64], strides = [1, 1]} : vector<2x256xf32> to vector<2x64xf32>
    %100 = vector.extract_strided_slice %97 {offsets = [0, 128], sizes = [2, 64], strides = [1, 1]} : vector<2x256xf32> to vector<2x64xf32>
    %101 = vector.extract_strided_slice %96 {offsets = [0, 192], sizes = [2, 64], strides = [1, 1]} : vector<2x256xf32> to vector<2x64xf32>
    %102 = arith.mulf %99, %80 : vector<2x64xf32>
    %103 = arith.mulf %98, %100 : vector<2x64xf32>
    %104 = arith.addf %102, %103 : vector<2x64xf32>
    %105 = math.tanh %104 : vector<2x64xf32>
    %106 = arith.mulf %101, %105 : vector<2x64xf32>
    %107 = vector.extract_strided_slice %106 {offsets = [0, 0], sizes = [2, 32], strides = [1, 1]} : vector<2x64xf32> to vector<2x32xf32>
    %c6_42 = arith.constant 6 : index
    %c0_43 = arith.constant 0 : index
    %108 = vector.load %arg12[%c6_42, %c0_43] : memref<16x64xf32, #tpu.memory_space<vmem>>, vector<2x32xf32>
    tpu.vector_store %arg12[%c6_42, %c0_43], %107 {strides = array<i32>} : memref<16x64xf32, #tpu.memory_space<vmem>>, vector<2x32xf32>,
    %109 = vector.extract_strided_slice %106 {offsets = [0, 32], sizes = [2, 32], strides = [1, 1]} : vector<2x64xf32> to vector<2x32xf32>
    %c8_44 = arith.constant 8 : index
    %c32_45 = arith.constant 32 : index
    %110 = vector.load %arg12[%c8_44, %c32_45] : memref<16x64xf32, #tpu.memory_space<vmem>>, vector<2x32xf32>
    tpu.vector_store %arg12[%c8_44, %c32_45], %109 {strides = array<i32>} : memref<16x64xf32, #tpu.memory_space<vmem>>, vector<2x32xf32>,
    %c8_46 = arith.constant 8 : index
    %c0_47 = arith.constant 0 : index
    %111 = vector.load %arg11[%c8_46, %c0_47] : memref<16x256xf32, #tpu.memory_space<vmem>>, vector<2x256xf32>
    %c6_48 = arith.constant 6 : index
    %c0_49 = arith.constant 0 : index
    %112 = vector.load %arg11[%c6_48, %c0_49] : memref<16x256xf32, #tpu.memory_space<vmem>>, vector<2x256xf32>
    %113 = arith.select %4, %111, %112 : vector<2x256xi1>, vector<2x256xf32>
    %cst_50 = arith.constant dense<0.000000e+00> : vector<2x256xf32>
    %114 = tpu.matmul %106, %12, %cst_50 {dimension_numbers = #tpu.dot_dimension_numbers<[1], [0], [0], [1], [0, 0, 1, 1], [], []>} : vector<2x64xf32>, vector<64x256xf32>, vector<2x256xf32> -> vector<2x256xf32>
    %115 = arith.addf %113, %114 : vector<2x256xf32>
    %116 = arith.negf %115 : vector<2x256xf32>
    %117 = math.exp %116 : vector<2x256xf32>
    %cst_51 = arith.constant 1.000000e+00 : f32
    %118 = vector.broadcast %cst_51 : f32 to vector<2x256xf32>
    %119 = arith.addf %118, %117 : vector<2x256xf32>
    %120 = arith.divf %118, %119 : vector<2x256xf32>
    %121 = math.tanh %115 : vector<2x256xf32>
    %122 = vector.extract_strided_slice %120 {offsets = [0, 0], sizes = [2, 64], strides = [1, 1]} : vector<2x256xf32> to vector<2x64xf32>
    %123 = vector.extract_strided_slice %120 {offsets = [0, 64], sizes = [2, 64], strides = [1, 1]} : vector<2x256xf32> to vector<2x64xf32>
    %124 = vector.extract_strided_slice %121 {offsets = [0, 128], sizes = [2, 64], strides = [1, 1]} : vector<2x256xf32> to vector<2x64xf32>
    %125 = vector.extract_strided_slice %120 {offsets = [0, 192], sizes = [2, 64], strides = [1, 1]} : vector<2x256xf32> to vector<2x64xf32>
    %126 = arith.mulf %123, %104 : vector<2x64xf32>
    %127 = arith.mulf %122, %124 : vector<2x64xf32>
    %128 = arith.addf %126, %127 : vector<2x64xf32>
    %129 = math.tanh %128 : vector<2x64xf32>
    %130 = arith.mulf %125, %129 : vector<2x64xf32>
    %131 = vector.extract_strided_slice %130 {offsets = [0, 0], sizes = [2, 32], strides = [1, 1]} : vector<2x64xf32> to vector<2x32xf32>
    %c8_52 = arith.constant 8 : index
    %c0_53 = arith.constant 0 : index
    %132 = vector.load %arg12[%c8_52, %c0_53] : memref<16x64xf32, #tpu.memory_space<vmem>>, vector<2x32xf32>
    tpu.vector_store %arg12[%c8_52, %c0_53], %131 {strides = array<i32>} : memref<16x64xf32, #tpu.memory_space<vmem>>, vector<2x32xf32>,
    %133 = vector.extract_strided_slice %130 {offsets = [0, 32], sizes = [2, 32], strides = [1, 1]} : vector<2x64xf32> to vector<2x32xf32>
    %c6_54 = arith.constant 6 : index
    %c32_55 = arith.constant 32 : index
    %134 = vector.load %arg12[%c6_54, %c32_55] : memref<16x64xf32, #tpu.memory_space<vmem>>, vector<2x32xf32>
    tpu.vector_store %arg12[%c6_54, %c32_55], %133 {strides = array<i32>} : memref<16x64xf32, #tpu.memory_space<vmem>>, vector<2x32xf32>,
    %c10_56 = arith.constant 10 : index
    %c0_57 = arith.constant 0 : index
    %135 = vector.load %arg11[%c10_56, %c0_57] : memref<16x256xf32, #tpu.memory_space<vmem>>, vector<2x256xf32>
    %c4_58 = arith.constant 4 : index
    %c0_59 = arith.constant 0 : index
    %136 = vector.load %arg11[%c4_58, %c0_59] : memref<16x256xf32, #tpu.memory_space<vmem>>, vector<2x256xf32>
    %137 = arith.select %4, %135, %136 : vector<2x256xi1>, vector<2x256xf32>
    %cst_60 = arith.constant dense<0.000000e+00> : vector<2x256xf32>
    %138 = tpu.matmul %130, %12, %cst_60 {dimension_numbers = #tpu.dot_dimension_numbers<[1], [0], [0], [1], [0, 0, 1, 1], [], []>} : vector<2x64xf32>, vector<64x256xf32>, vector<2x256xf32> -> vector<2x256xf32>
    %139 = arith.addf %137, %138 : vector<2x256xf32>
    %140 = arith.negf %139 : vector<2x256xf32>
    %141 = math.exp %140 : vector<2x256xf32>
    %cst_61 = arith.constant 1.000000e+00 : f32
    %142 = vector.broadcast %cst_61 : f32 to vector<2x256xf32>
    %143 = arith.addf %142, %141 : vector<2x256xf32>
    %144 = arith.divf %142, %143 : vector<2x256xf32>
    %145 = math.tanh %139 : vector<2x256xf32>
    %146 = vector.extract_strided_slice %144 {offsets = [0, 0], sizes = [2, 64], strides = [1, 1]} : vector<2x256xf32> to vector<2x64xf32>
    %147 = vector.extract_strided_slice %144 {offsets = [0, 64], sizes = [2, 64], strides = [1, 1]} : vector<2x256xf32> to vector<2x64xf32>
    %148 = vector.extract_strided_slice %145 {offsets = [0, 128], sizes = [2, 64], strides = [1, 1]} : vector<2x256xf32> to vector<2x64xf32>
    %149 = vector.extract_strided_slice %144 {offsets = [0, 192], sizes = [2, 64], strides = [1, 1]} : vector<2x256xf32> to vector<2x64xf32>
    %150 = arith.mulf %147, %128 : vector<2x64xf32>
    %151 = arith.mulf %146, %148 : vector<2x64xf32>
    %152 = arith.addf %150, %151 : vector<2x64xf32>
    %153 = math.tanh %152 : vector<2x64xf32>
    %154 = arith.mulf %149, %153 : vector<2x64xf32>
    %155 = vector.extract_strided_slice %154 {offsets = [0, 0], sizes = [2, 32], strides = [1, 1]} : vector<2x64xf32> to vector<2x32xf32>
    %c10_62 = arith.constant 10 : index
    %c0_63 = arith.constant 0 : index
    %156 = vector.load %arg12[%c10_62, %c0_63] : memref<16x64xf32, #tpu.memory_space<vmem>>, vector<2x32xf32>
    tpu.vector_store %arg12[%c10_62, %c0_63], %155 {strides = array<i32>} : memref<16x64xf32, #tpu.memory_space<vmem>>, vector<2x32xf32>,
    %157 = vector.extract_strided_slice %154 {offsets = [0, 32], sizes = [2, 32], strides = [1, 1]} : vector<2x64xf32> to vector<2x32xf32>
    %c4_64 = arith.constant 4 : index
    %c32_65 = arith.constant 32 : index
    %158 = vector.load %arg12[%c4_64, %c32_65] : memref<16x64xf32, #tpu.memory_space<vmem>>, vector<2x32xf32>
    tpu.vector_store %arg12[%c4_64, %c32_65], %157 {strides = array<i32>} : memref<16x64xf32, #tpu.memory_space<vmem>>, vector<2x32xf32>,
    %c12_66 = arith.constant 12 : index
    %c0_67 = arith.constant 0 : index
    %159 = vector.load %arg11[%c12_66, %c0_67] : memref<16x256xf32, #tpu.memory_space<vmem>>, vector<2x256xf32>
    %c2_68 = arith.constant 2 : index
    %c0_69 = arith.constant 0 : index
    %160 = vector.load %arg11[%c2_68, %c0_69] : memref<16x256xf32, #tpu.memory_space<vmem>>, vector<2x256xf32>
    %161 = arith.select %4, %159, %160 : vector<2x256xi1>, vector<2x256xf32>
    %cst_70 = arith.constant dense<0.000000e+00> : vector<2x256xf32>
    %162 = tpu.matmul %154, %12, %cst_70 {dimension_numbers = #tpu.dot_dimension_numbers<[1], [0], [0], [1], [0, 0, 1, 1], [], []>} : vector<2x64xf32>, vector<64x256xf32>, vector<2x256xf32> -> vector<2x256xf32>
    %163 = arith.addf %161, %162 : vector<2x256xf32>
    %164 = arith.negf %163 : vector<2x256xf32>
    %165 = math.exp %164 : vector<2x256xf32>
    %cst_71 = arith.constant 1.000000e+00 : f32
    %166 = vector.broadcast %cst_71 : f32 to vector<2x256xf32>
    %167 = arith.addf %166, %165 : vector<2x256xf32>
    %168 = arith.divf %166, %167 : vector<2x256xf32>
    %169 = math.tanh %163 : vector<2x256xf32>
    %170 = vector.extract_strided_slice %168 {offsets = [0, 0], sizes = [2, 64], strides = [1, 1]} : vector<2x256xf32> to vector<2x64xf32>
    %171 = vector.extract_strided_slice %168 {offsets = [0, 64], sizes = [2, 64], strides = [1, 1]} : vector<2x256xf32> to vector<2x64xf32>
    %172 = vector.extract_strided_slice %169 {offsets = [0, 128], sizes = [2, 64], strides = [1, 1]} : vector<2x256xf32> to vector<2x64xf32>
    %173 = vector.extract_strided_slice %168 {offsets = [0, 192], sizes = [2, 64], strides = [1, 1]} : vector<2x256xf32> to vector<2x64xf32>
    %174 = arith.mulf %171, %152 : vector<2x64xf32>
    %175 = arith.mulf %170, %172 : vector<2x64xf32>
    %176 = arith.addf %174, %175 : vector<2x64xf32>
    %177 = math.tanh %176 : vector<2x64xf32>
    %178 = arith.mulf %173, %177 : vector<2x64xf32>
    %179 = vector.extract_strided_slice %178 {offsets = [0, 0], sizes = [2, 32], strides = [1, 1]} : vector<2x64xf32> to vector<2x32xf32>
    %c12_72 = arith.constant 12 : index
    %c0_73 = arith.constant 0 : index
    %180 = vector.load %arg12[%c12_72, %c0_73] : memref<16x64xf32, #tpu.memory_space<vmem>>, vector<2x32xf32>
    tpu.vector_store %arg12[%c12_72, %c0_73], %179 {strides = array<i32>} : memref<16x64xf32, #tpu.memory_space<vmem>>, vector<2x32xf32>,
    %181 = vector.extract_strided_slice %178 {offsets = [0, 32], sizes = [2, 32], strides = [1, 1]} : vector<2x64xf32> to vector<2x32xf32>
    %c2_74 = arith.constant 2 : index
    %c32_75 = arith.constant 32 : index
    %182 = vector.load %arg12[%c2_74, %c32_75] : memref<16x64xf32, #tpu.memory_space<vmem>>, vector<2x32xf32>
    tpu.vector_store %arg12[%c2_74, %c32_75], %181 {strides = array<i32>} : memref<16x64xf32, #tpu.memory_space<vmem>>, vector<2x32xf32>,
    %c14_76 = arith.constant 14 : index
    %c0_77 = arith.constant 0 : index
    %183 = vector.load %arg11[%c14_76, %c0_77] : memref<16x256xf32, #tpu.memory_space<vmem>>, vector<2x256xf32>
    %c0_78 = arith.constant 0 : index
    %c0_79 = arith.constant 0 : index
    %184 = vector.load %arg11[%c0_78, %c0_79] : memref<16x256xf32, #tpu.memory_space<vmem>>, vector<2x256xf32>
    %185 = arith.select %4, %183, %184 : vector<2x256xi1>, vector<2x256xf32>
    %cst_80 = arith.constant dense<0.000000e+00> : vector<2x256xf32>
    %186 = tpu.matmul %178, %12, %cst_80 {dimension_numbers = #tpu.dot_dimension_numbers<[1], [0], [0], [1], [0, 0, 1, 1], [], []>} : vector<2x64xf32>, vector<64x256xf32>, vector<2x256xf32> -> vector<2x256xf32>
    %187 = arith.addf %185, %186 : vector<2x256xf32>
    %188 = arith.negf %187 : vector<2x256xf32>
    %189 = math.exp %188 : vector<2x256xf32>
    %cst_81 = arith.constant 1.000000e+00 : f32
    %190 = vector.broadcast %cst_81 : f32 to vector<2x256xf32>
    %191 = arith.addf %190, %189 : vector<2x256xf32>
    %192 = arith.divf %190, %191 : vector<2x256xf32>
    %193 = math.tanh %187 : vector<2x256xf32>
    %194 = vector.extract_strided_slice %192 {offsets = [0, 0], sizes = [2, 64], strides = [1, 1]} : vector<2x256xf32> to vector<2x64xf32>
    %195 = vector.extract_strided_slice %192 {offsets = [0, 64], sizes = [2, 64], strides = [1, 1]} : vector<2x256xf32> to vector<2x64xf32>
    %196 = vector.extract_strided_slice %193 {offsets = [0, 128], sizes = [2, 64], strides = [1, 1]} : vector<2x256xf32> to vector<2x64xf32>
    %197 = vector.extract_strided_slice %192 {offsets = [0, 192], sizes = [2, 64], strides = [1, 1]} : vector<2x256xf32> to vector<2x64xf32>
    %198 = arith.mulf %195, %176 : vector<2x64xf32>
    %199 = arith.mulf %194, %196 : vector<2x64xf32>
    %200 = arith.addf %198, %199 : vector<2x64xf32>
    %201 = math.tanh %200 : vector<2x64xf32>
    %202 = arith.mulf %197, %201 : vector<2x64xf32>
    %203 = vector.extract_strided_slice %202 {offsets = [0, 0], sizes = [2, 32], strides = [1, 1]} : vector<2x64xf32> to vector<2x32xf32>
    %c14_82 = arith.constant 14 : index
    %c0_83 = arith.constant 0 : index
    %204 = vector.load %arg12[%c14_82, %c0_83] : memref<16x64xf32, #tpu.memory_space<vmem>>, vector<2x32xf32>
    tpu.vector_store %arg12[%c14_82, %c0_83], %203 {strides = array<i32>} : memref<16x64xf32, #tpu.memory_space<vmem>>, vector<2x32xf32>,
    %205 = vector.extract_strided_slice %202 {offsets = [0, 32], sizes = [2, 32], strides = [1, 1]} : vector<2x64xf32> to vector<2x32xf32>
    %c0_84 = arith.constant 0 : index
    %c32_85 = arith.constant 32 : index
    %206 = vector.load %arg12[%c0_84, %c32_85] : memref<16x64xf32, #tpu.memory_space<vmem>>, vector<2x32xf32>
    tpu.vector_store %arg12[%c0_84, %c32_85], %205 {strides = array<i32>} : memref<16x64xf32, #tpu.memory_space<vmem>>, vector<2x32xf32>,
    %c0_86 = arith.constant 0 : index
    %c0_87 = arith.constant 0 : index
    %207 = vector.load %arg12[%c0_86, %c0_87] : memref<16x64xf32, #tpu.memory_space<vmem>>, vector<16x64xf32>
    %c0_88 = arith.constant 0 : index
    %c0_89 = arith.constant 0 : index
    %208 = vector.load %arg5[%c0_88, %c0_89] : memref<64x256xf32, #tpu.memory_space<vmem>>, vector<64x256xf32>
    %cst_90 = arith.constant dense<0.000000e+00> : vector<16x256xf32>
    %209 = tpu.matmul %207, %208, %cst_90 {dimension_numbers = #tpu.dot_dimension_numbers<[1], [0], [0], [1], [0, 0, 1, 1], [], []>} : vector<16x64xf32>, vector<64x256xf32>, vector<16x256xf32> -> vector<16x256xf32>
    %c0_91 = arith.constant 0 : index
    %c0_92 = arith.constant 0 : index
    %210 = vector.load %arg7[%c0_91, %c0_92] : memref<1x256xf32, #tpu.memory_space<vmem>>, vector<1x256xf32>
    %211 = vector.broadcast %210 : vector<1x256xf32> to vector<16x256xf32>
    %212 = arith.addf %209, %211 : vector<16x256xf32>
    %c0_93 = arith.constant 0 : index
    %c0_94 = arith.constant 0 : index
    %213 = vector.load %arg11[%c0_93, %c0_94] : memref<16x256xf32, #tpu.memory_space<vmem>>, vector<16x256xf32>
    tpu.vector_store %arg11[%c0_93, %c0_94], %212 {strides = array<i32>} : memref<16x256xf32, #tpu.memory_space<vmem>>, vector<16x256xf32>,
    %c0_95 = arith.constant 0 : index
    %c0_96 = arith.constant 0 : index
    %214 = vector.load %arg6[%c0_95, %c0_96] : memref<64x256xf32, #tpu.memory_space<vmem>>, vector<64x256xf32>
    %cst_97 = arith.constant 0.000000e+00 : f32
    %215 = vector.broadcast %cst_97 : f32 to vector<2x64xf32>
    %cst_98 = arith.constant 0.000000e+00 : f32
    %216 = vector.broadcast %cst_98 : f32 to vector<2x64xf32>
    %c0_99 = arith.constant 0 : index
    %c0_100 = arith.constant 0 : index
    %217 = vector.load %arg11[%c0_99, %c0_100] : memref<16x256xf32, #tpu.memory_space<vmem>>, vector<2x256xf32>
    %c14_101 = arith.constant 14 : index
    %c0_102 = arith.constant 0 : index
    %218 = vector.load %arg11[%c14_101, %c0_102] : memref<16x256xf32, #tpu.memory_space<vmem>>, vector<2x256xf32>
    %219 = arith.select %4, %217, %218 : vector<2x256xi1>, vector<2x256xf32>
    %cst_103 = arith.constant dense<0.000000e+00> : vector<2x256xf32>
    %220 = tpu.matmul %215, %214, %cst_103 {dimension_numbers = #tpu.dot_dimension_numbers<[1], [0], [0], [1], [0, 0, 1, 1], [], []>} : vector<2x64xf32>, vector<64x256xf32>, vector<2x256xf32> -> vector<2x256xf32>
    %221 = arith.addf %219, %220 : vector<2x256xf32>
    %222 = arith.negf %221 : vector<2x256xf32>
    %223 = math.exp %222 : vector<2x256xf32>
    %cst_104 = arith.constant 1.000000e+00 : f32
    %224 = vector.broadcast %cst_104 : f32 to vector<2x256xf32>
    %225 = arith.addf %224, %223 : vector<2x256xf32>
    %226 = arith.divf %224, %225 : vector<2x256xf32>
    %227 = math.tanh %221 : vector<2x256xf32>
    %228 = vector.extract_strided_slice %226 {offsets = [0, 0], sizes = [2, 64], strides = [1, 1]} : vector<2x256xf32> to vector<2x64xf32>
    %229 = vector.extract_strided_slice %226 {offsets = [0, 64], sizes = [2, 64], strides = [1, 1]} : vector<2x256xf32> to vector<2x64xf32>
    %230 = vector.extract_strided_slice %227 {offsets = [0, 128], sizes = [2, 64], strides = [1, 1]} : vector<2x256xf32> to vector<2x64xf32>
    %231 = vector.extract_strided_slice %226 {offsets = [0, 192], sizes = [2, 64], strides = [1, 1]} : vector<2x256xf32> to vector<2x64xf32>
    %232 = arith.mulf %229, %216 : vector<2x64xf32>
    %233 = arith.mulf %228, %230 : vector<2x64xf32>
    %234 = arith.addf %232, %233 : vector<2x64xf32>
    %235 = math.tanh %234 : vector<2x64xf32>
    %236 = arith.mulf %231, %235 : vector<2x64xf32>
    %c2_105 = arith.constant 2 : index
    %c0_106 = arith.constant 0 : index
    %237 = vector.load %arg11[%c2_105, %c0_106] : memref<16x256xf32, #tpu.memory_space<vmem>>, vector<2x256xf32>
    %c12_107 = arith.constant 12 : index
    %c0_108 = arith.constant 0 : index
    %238 = vector.load %arg11[%c12_107, %c0_108] : memref<16x256xf32, #tpu.memory_space<vmem>>, vector<2x256xf32>
    %239 = arith.select %4, %237, %238 : vector<2x256xi1>, vector<2x256xf32>
    %cst_109 = arith.constant dense<0.000000e+00> : vector<2x256xf32>
    %240 = tpu.matmul %236, %214, %cst_109 {dimension_numbers = #tpu.dot_dimension_numbers<[1], [0], [0], [1], [0, 0, 1, 1], [], []>} : vector<2x64xf32>, vector<64x256xf32>, vector<2x256xf32> -> vector<2x256xf32>
    %241 = arith.addf %239, %240 : vector<2x256xf32>
    %242 = arith.negf %241 : vector<2x256xf32>
    %243 = math.exp %242 : vector<2x256xf32>
    %cst_110 = arith.constant 1.000000e+00 : f32
    %244 = vector.broadcast %cst_110 : f32 to vector<2x256xf32>
    %245 = arith.addf %244, %243 : vector<2x256xf32>
    %246 = arith.divf %244, %245 : vector<2x256xf32>
    %247 = math.tanh %241 : vector<2x256xf32>
    %248 = vector.extract_strided_slice %246 {offsets = [0, 0], sizes = [2, 64], strides = [1, 1]} : vector<2x256xf32> to vector<2x64xf32>
    %249 = vector.extract_strided_slice %246 {offsets = [0, 64], sizes = [2, 64], strides = [1, 1]} : vector<2x256xf32> to vector<2x64xf32>
    %250 = vector.extract_strided_slice %247 {offsets = [0, 128], sizes = [2, 64], strides = [1, 1]} : vector<2x256xf32> to vector<2x64xf32>
    %251 = vector.extract_strided_slice %246 {offsets = [0, 192], sizes = [2, 64], strides = [1, 1]} : vector<2x256xf32> to vector<2x64xf32>
    %252 = arith.mulf %249, %234 : vector<2x64xf32>
    %253 = arith.mulf %248, %250 : vector<2x64xf32>
    %254 = arith.addf %252, %253 : vector<2x64xf32>
    %255 = math.tanh %254 : vector<2x64xf32>
    %256 = arith.mulf %251, %255 : vector<2x64xf32>
    %c4_111 = arith.constant 4 : index
    %c0_112 = arith.constant 0 : index
    %257 = vector.load %arg11[%c4_111, %c0_112] : memref<16x256xf32, #tpu.memory_space<vmem>>, vector<2x256xf32>
    %c10_113 = arith.constant 10 : index
    %c0_114 = arith.constant 0 : index
    %258 = vector.load %arg11[%c10_113, %c0_114] : memref<16x256xf32, #tpu.memory_space<vmem>>, vector<2x256xf32>
    %259 = arith.select %4, %257, %258 : vector<2x256xi1>, vector<2x256xf32>
    %cst_115 = arith.constant dense<0.000000e+00> : vector<2x256xf32>
    %260 = tpu.matmul %256, %214, %cst_115 {dimension_numbers = #tpu.dot_dimension_numbers<[1], [0], [0], [1], [0, 0, 1, 1], [], []>} : vector<2x64xf32>, vector<64x256xf32>, vector<2x256xf32> -> vector<2x256xf32>
    %261 = arith.addf %259, %260 : vector<2x256xf32>
    %262 = arith.negf %261 : vector<2x256xf32>
    %263 = math.exp %262 : vector<2x256xf32>
    %cst_116 = arith.constant 1.000000e+00 : f32
    %264 = vector.broadcast %cst_116 : f32 to vector<2x256xf32>
    %265 = arith.addf %264, %263 : vector<2x256xf32>
    %266 = arith.divf %264, %265 : vector<2x256xf32>
    %267 = math.tanh %261 : vector<2x256xf32>
    %268 = vector.extract_strided_slice %266 {offsets = [0, 0], sizes = [2, 64], strides = [1, 1]} : vector<2x256xf32> to vector<2x64xf32>
    %269 = vector.extract_strided_slice %266 {offsets = [0, 64], sizes = [2, 64], strides = [1, 1]} : vector<2x256xf32> to vector<2x64xf32>
    %270 = vector.extract_strided_slice %267 {offsets = [0, 128], sizes = [2, 64], strides = [1, 1]} : vector<2x256xf32> to vector<2x64xf32>
    %271 = vector.extract_strided_slice %266 {offsets = [0, 192], sizes = [2, 64], strides = [1, 1]} : vector<2x256xf32> to vector<2x64xf32>
    %272 = arith.mulf %269, %254 : vector<2x64xf32>
    %273 = arith.mulf %268, %270 : vector<2x64xf32>
    %274 = arith.addf %272, %273 : vector<2x64xf32>
    %275 = math.tanh %274 : vector<2x64xf32>
    %276 = arith.mulf %271, %275 : vector<2x64xf32>
    %c6_117 = arith.constant 6 : index
    %c0_118 = arith.constant 0 : index
    %277 = vector.load %arg11[%c6_117, %c0_118] : memref<16x256xf32, #tpu.memory_space<vmem>>, vector<2x256xf32>
    %c8_119 = arith.constant 8 : index
    %c0_120 = arith.constant 0 : index
    %278 = vector.load %arg11[%c8_119, %c0_120] : memref<16x256xf32, #tpu.memory_space<vmem>>, vector<2x256xf32>
    %279 = arith.select %4, %277, %278 : vector<2x256xi1>, vector<2x256xf32>
    %cst_121 = arith.constant dense<0.000000e+00> : vector<2x256xf32>
    %280 = tpu.matmul %276, %214, %cst_121 {dimension_numbers = #tpu.dot_dimension_numbers<[1], [0], [0], [1], [0, 0, 1, 1], [], []>} : vector<2x64xf32>, vector<64x256xf32>, vector<2x256xf32> -> vector<2x256xf32>
    %281 = arith.addf %279, %280 : vector<2x256xf32>
    %282 = arith.negf %281 : vector<2x256xf32>
    %283 = math.exp %282 : vector<2x256xf32>
    %cst_122 = arith.constant 1.000000e+00 : f32
    %284 = vector.broadcast %cst_122 : f32 to vector<2x256xf32>
    %285 = arith.addf %284, %283 : vector<2x256xf32>
    %286 = arith.divf %284, %285 : vector<2x256xf32>
    %287 = math.tanh %281 : vector<2x256xf32>
    %288 = vector.extract_strided_slice %286 {offsets = [0, 0], sizes = [2, 64], strides = [1, 1]} : vector<2x256xf32> to vector<2x64xf32>
    %289 = vector.extract_strided_slice %286 {offsets = [0, 64], sizes = [2, 64], strides = [1, 1]} : vector<2x256xf32> to vector<2x64xf32>
    %290 = vector.extract_strided_slice %287 {offsets = [0, 128], sizes = [2, 64], strides = [1, 1]} : vector<2x256xf32> to vector<2x64xf32>
    %291 = vector.extract_strided_slice %286 {offsets = [0, 192], sizes = [2, 64], strides = [1, 1]} : vector<2x256xf32> to vector<2x64xf32>
    %292 = arith.mulf %289, %274 : vector<2x64xf32>
    %293 = arith.mulf %288, %290 : vector<2x64xf32>
    %294 = arith.addf %292, %293 : vector<2x64xf32>
    %295 = math.tanh %294 : vector<2x64xf32>
    %296 = arith.mulf %291, %295 : vector<2x64xf32>
    %c8_123 = arith.constant 8 : index
    %c0_124 = arith.constant 0 : index
    %297 = vector.load %arg11[%c8_123, %c0_124] : memref<16x256xf32, #tpu.memory_space<vmem>>, vector<2x256xf32>
    %c6_125 = arith.constant 6 : index
    %c0_126 = arith.constant 0 : index
    %298 = vector.load %arg11[%c6_125, %c0_126] : memref<16x256xf32, #tpu.memory_space<vmem>>, vector<2x256xf32>
    %299 = arith.select %4, %297, %298 : vector<2x256xi1>, vector<2x256xf32>
    %cst_127 = arith.constant dense<0.000000e+00> : vector<2x256xf32>
    %300 = tpu.matmul %296, %214, %cst_127 {dimension_numbers = #tpu.dot_dimension_numbers<[1], [0], [0], [1], [0, 0, 1, 1], [], []>} : vector<2x64xf32>, vector<64x256xf32>, vector<2x256xf32> -> vector<2x256xf32>
    %301 = arith.addf %299, %300 : vector<2x256xf32>
    %302 = arith.negf %301 : vector<2x256xf32>
    %303 = math.exp %302 : vector<2x256xf32>
    %cst_128 = arith.constant 1.000000e+00 : f32
    %304 = vector.broadcast %cst_128 : f32 to vector<2x256xf32>
    %305 = arith.addf %304, %303 : vector<2x256xf32>
    %306 = arith.divf %304, %305 : vector<2x256xf32>
    %307 = math.tanh %301 : vector<2x256xf32>
    %308 = vector.extract_strided_slice %306 {offsets = [0, 0], sizes = [2, 64], strides = [1, 1]} : vector<2x256xf32> to vector<2x64xf32>
    %309 = vector.extract_strided_slice %306 {offsets = [0, 64], sizes = [2, 64], strides = [1, 1]} : vector<2x256xf32> to vector<2x64xf32>
    %310 = vector.extract_strided_slice %307 {offsets = [0, 128], sizes = [2, 64], strides = [1, 1]} : vector<2x256xf32> to vector<2x64xf32>
    %311 = vector.extract_strided_slice %306 {offsets = [0, 192], sizes = [2, 64], strides = [1, 1]} : vector<2x256xf32> to vector<2x64xf32>
    %312 = arith.mulf %309, %294 : vector<2x64xf32>
    %313 = arith.mulf %308, %310 : vector<2x64xf32>
    %314 = arith.addf %312, %313 : vector<2x64xf32>
    %315 = math.tanh %314 : vector<2x64xf32>
    %316 = arith.mulf %311, %315 : vector<2x64xf32>
    %c10_129 = arith.constant 10 : index
    %c0_130 = arith.constant 0 : index
    %317 = vector.load %arg11[%c10_129, %c0_130] : memref<16x256xf32, #tpu.memory_space<vmem>>, vector<2x256xf32>
    %c4_131 = arith.constant 4 : index
    %c0_132 = arith.constant 0 : index
    %318 = vector.load %arg11[%c4_131, %c0_132] : memref<16x256xf32, #tpu.memory_space<vmem>>, vector<2x256xf32>
    %319 = arith.select %4, %317, %318 : vector<2x256xi1>, vector<2x256xf32>
    %cst_133 = arith.constant dense<0.000000e+00> : vector<2x256xf32>
    %320 = tpu.matmul %316, %214, %cst_133 {dimension_numbers = #tpu.dot_dimension_numbers<[1], [0], [0], [1], [0, 0, 1, 1], [], []>} : vector<2x64xf32>, vector<64x256xf32>, vector<2x256xf32> -> vector<2x256xf32>
    %321 = arith.addf %319, %320 : vector<2x256xf32>
    %322 = arith.negf %321 : vector<2x256xf32>
    %323 = math.exp %322 : vector<2x256xf32>
    %cst_134 = arith.constant 1.000000e+00 : f32
    %324 = vector.broadcast %cst_134 : f32 to vector<2x256xf32>
    %325 = arith.addf %324, %323 : vector<2x256xf32>
    %326 = arith.divf %324, %325 : vector<2x256xf32>
    %327 = math.tanh %321 : vector<2x256xf32>
    %328 = vector.extract_strided_slice %326 {offsets = [0, 0], sizes = [2, 64], strides = [1, 1]} : vector<2x256xf32> to vector<2x64xf32>
    %329 = vector.extract_strided_slice %326 {offsets = [0, 64], sizes = [2, 64], strides = [1, 1]} : vector<2x256xf32> to vector<2x64xf32>
    %330 = vector.extract_strided_slice %327 {offsets = [0, 128], sizes = [2, 64], strides = [1, 1]} : vector<2x256xf32> to vector<2x64xf32>
    %331 = vector.extract_strided_slice %326 {offsets = [0, 192], sizes = [2, 64], strides = [1, 1]} : vector<2x256xf32> to vector<2x64xf32>
    %332 = arith.mulf %329, %314 : vector<2x64xf32>
    %333 = arith.mulf %328, %330 : vector<2x64xf32>
    %334 = arith.addf %332, %333 : vector<2x64xf32>
    %335 = math.tanh %334 : vector<2x64xf32>
    %336 = arith.mulf %331, %335 : vector<2x64xf32>
    %c12_135 = arith.constant 12 : index
    %c0_136 = arith.constant 0 : index
    %337 = vector.load %arg11[%c12_135, %c0_136] : memref<16x256xf32, #tpu.memory_space<vmem>>, vector<2x256xf32>
    %c2_137 = arith.constant 2 : index
    %c0_138 = arith.constant 0 : index
    %338 = vector.load %arg11[%c2_137, %c0_138] : memref<16x256xf32, #tpu.memory_space<vmem>>, vector<2x256xf32>
    %339 = arith.select %4, %337, %338 : vector<2x256xi1>, vector<2x256xf32>
    %cst_139 = arith.constant dense<0.000000e+00> : vector<2x256xf32>
    %340 = tpu.matmul %336, %214, %cst_139 {dimension_numbers = #tpu.dot_dimension_numbers<[1], [0], [0], [1], [0, 0, 1, 1], [], []>} : vector<2x64xf32>, vector<64x256xf32>, vector<2x256xf32> -> vector<2x256xf32>
    %341 = arith.addf %339, %340 : vector<2x256xf32>
    %342 = arith.negf %341 : vector<2x256xf32>
    %343 = math.exp %342 : vector<2x256xf32>
    %cst_140 = arith.constant 1.000000e+00 : f32
    %344 = vector.broadcast %cst_140 : f32 to vector<2x256xf32>
    %345 = arith.addf %344, %343 : vector<2x256xf32>
    %346 = arith.divf %344, %345 : vector<2x256xf32>
    %347 = math.tanh %341 : vector<2x256xf32>
    %348 = vector.extract_strided_slice %346 {offsets = [0, 0], sizes = [2, 64], strides = [1, 1]} : vector<2x256xf32> to vector<2x64xf32>
    %349 = vector.extract_strided_slice %346 {offsets = [0, 64], sizes = [2, 64], strides = [1, 1]} : vector<2x256xf32> to vector<2x64xf32>
    %350 = vector.extract_strided_slice %347 {offsets = [0, 128], sizes = [2, 64], strides = [1, 1]} : vector<2x256xf32> to vector<2x64xf32>
    %351 = vector.extract_strided_slice %346 {offsets = [0, 192], sizes = [2, 64], strides = [1, 1]} : vector<2x256xf32> to vector<2x64xf32>
    %352 = arith.mulf %349, %334 : vector<2x64xf32>
    %353 = arith.mulf %348, %350 : vector<2x64xf32>
    %354 = arith.addf %352, %353 : vector<2x64xf32>
    %355 = math.tanh %354 : vector<2x64xf32>
    %356 = arith.mulf %351, %355 : vector<2x64xf32>
    %c14_141 = arith.constant 14 : index
    %c0_142 = arith.constant 0 : index
    %357 = vector.load %arg11[%c14_141, %c0_142] : memref<16x256xf32, #tpu.memory_space<vmem>>, vector<2x256xf32>
    %c0_143 = arith.constant 0 : index
    %c0_144 = arith.constant 0 : index
    %358 = vector.load %arg11[%c0_143, %c0_144] : memref<16x256xf32, #tpu.memory_space<vmem>>, vector<2x256xf32>
    %359 = arith.select %4, %357, %358 : vector<2x256xi1>, vector<2x256xf32>
    %cst_145 = arith.constant dense<0.000000e+00> : vector<2x256xf32>
    %360 = tpu.matmul %356, %214, %cst_145 {dimension_numbers = #tpu.dot_dimension_numbers<[1], [0], [0], [1], [0, 0, 1, 1], [], []>} : vector<2x64xf32>, vector<64x256xf32>, vector<2x256xf32> -> vector<2x256xf32>
    %361 = arith.addf %359, %360 : vector<2x256xf32>
    %362 = arith.negf %361 : vector<2x256xf32>
    %363 = math.exp %362 : vector<2x256xf32>
    %cst_146 = arith.constant 1.000000e+00 : f32
    %364 = vector.broadcast %cst_146 : f32 to vector<2x256xf32>
    %365 = arith.addf %364, %363 : vector<2x256xf32>
    %366 = arith.divf %364, %365 : vector<2x256xf32>
    %367 = math.tanh %361 : vector<2x256xf32>
    %368 = vector.extract_strided_slice %366 {offsets = [0, 0], sizes = [2, 64], strides = [1, 1]} : vector<2x256xf32> to vector<2x64xf32>
    %369 = vector.extract_strided_slice %366 {offsets = [0, 64], sizes = [2, 64], strides = [1, 1]} : vector<2x256xf32> to vector<2x64xf32>
    %370 = vector.extract_strided_slice %367 {offsets = [0, 128], sizes = [2, 64], strides = [1, 1]} : vector<2x256xf32> to vector<2x64xf32>
    %371 = vector.extract_strided_slice %366 {offsets = [0, 192], sizes = [2, 64], strides = [1, 1]} : vector<2x256xf32> to vector<2x64xf32>
    %372 = arith.mulf %369, %354 : vector<2x64xf32>
    %373 = arith.mulf %368, %370 : vector<2x64xf32>
    %374 = arith.addf %372, %373 : vector<2x64xf32>
    %375 = math.tanh %374 : vector<2x64xf32>
    %376 = arith.mulf %371, %375 : vector<2x64xf32>
    %c0_147 = arith.constant 0 : index
    %c0_148 = arith.constant 0 : index
    %377 = vector.load %arg8[%c0_147, %c0_148] : memref<1x128xf32, #tpu.memory_space<vmem>>, vector<1x128xf32>
    %378 = vector.extract_strided_slice %377 {offsets = [0, 0], sizes = [1, 64], strides = [1, 1]} : vector<1x128xf32> to vector<1x64xf32>
    %379 = vector.broadcast %378 : vector<1x64xf32> to vector<2x64xf32>
    %380 = arith.mulf %202, %379 : vector<2x64xf32>
    %cst_149 = arith.constant dense<0.000000e+00> : vector<2xf32>
    %381 = vector.multi_reduction <add>, %380, %cst_149 [1] : vector<2x64xf32> to vector<2xf32>
    %382 = vector.shape_cast %381 : vector<2xf32> to vector<2x1xf32>
    %383 = vector.extract_strided_slice %377 {offsets = [0, 64], sizes = [1, 64], strides = [1, 1]} : vector<1x128xf32> to vector<1x64xf32>
    %384 = vector.broadcast %383 : vector<1x64xf32> to vector<2x64xf32>
    %385 = arith.mulf %376, %384 : vector<2x64xf32>
    %cst_150 = arith.constant dense<0.000000e+00> : vector<2xf32>
    %386 = vector.multi_reduction <add>, %385, %cst_150 [1] : vector<2x64xf32> to vector<2xf32>
    %387 = vector.shape_cast %386 : vector<2xf32> to vector<2x1xf32>
    %388 = arith.addf %382, %387 : vector<2x1xf32>
    %c0_151 = arith.constant 0 : index
    %c0_152 = arith.constant 0 : index
    %389 = vector.load %arg9[%c0_151, %c0_152] : memref<1x1xf32, #tpu.memory_space<vmem>>, vector<1x1xf32>
    %390 = vector.broadcast %389 : vector<1x1xf32> to vector<2x1xf32>
    %391 = arith.addf %388, %390 : vector<2x1xf32>
    %c0_153 = arith.constant 0 : index
    %c0_154 = arith.constant 0 : index
    %392 = vector.load %arg10[%c0_153, %c0_154] : memref<2x1xf32, #tpu.memory_space<vmem>>, vector<2x1xf32>
    tpu.vector_store %arg10[%c0_153, %c0_154], %391 {strides = array<i32>} : memref<2x1xf32, #tpu.memory_space<vmem>>, vector<2x1xf32>,
    return
  }
}

</mosaic_0001>

<bundles_post_ra>
// kernel: tpu_custom_call.1
= control target key start
LH: loop header
LB: loop body
LE: loop exit
PB: predicated region body
PF: predicated region fallthrough
CT: control target
= control target key end

     0   :  { %s3599_s0 = inlined_call_operand.hbm [shape: f32[16,32], index: 0, kind: input, shape index: {}]   ;;  %s3600_s1 = inlined_call_operand.vmem [shape: f32[1,256], index: 1, kind: input, shape index: {}]   ;;  %s3601_s2 = inlined_call_operand.hbm [shape: f32[32,256], index: 2, kind: input, shape index: {}]   ;;  %s3602_s3 = inlined_call_operand.hbm [shape: f32[64,256], index: 3, kind: input, shape index: {}]   ;;  %s3603_s4 = inlined_call_operand.vmem [shape: f32[1,256], index: 4, kind: input, shape index: {}]   ;;  %s3604_s5 = inlined_call_operand.hbm [shape: f32[64,256], index: 5, kind: input, shape index: {}]   ;;  %s3605_s6 = inlined_call_operand.hbm [shape: f32[64,256], index: 6, kind: input, shape index: {}]   ;;  %s3606_s7 = inlined_call_operand.vmem [shape: f32[1,256], index: 7, kind: input, shape index: {}]   ;;  %s3607_s8 = inlined_call_operand.vmem [shape: f32[1,128], index: 8, kind: input, shape index: {}]   ;;  %s3608_s9 = inlined_call_operand.<no memory space> [shape: f32[1,1], index: 9, kind: input, shape index: {}]   ;;  %s3609_s10 = inlined_call_operand.vmem [shape: f32[2,1], index: 10, kind: output, shape index: {}]  }
   0x1   :  { %v15_v0 = vstv %s3608_s9 }
   0x2   :  { %16 = vst [vmem:[#allocation4] sm:$0x1] %v15_v0 }
   0x3   :  { %17 = vsyncpa [#allocation6], 0 }
   0x4   :  { %18 = vsyncpa [#allocation8], 0 }
   0x5   :  { %19 = vsyncpa [#allocation11], 0  ;;  %s3013_s15 = smov [#allocation7]   ;;  %s2897_s19 = scalar_lea.hbm %s3601_s2, 1024 }
   0x6   :  { %s39_s16 = sshll.u32 %s3013_s15, 4  ;;  %p2898_p0 = scmp.ne.s32.totalorder %s3601_s2, %s2897_s19  ;;  %s40_s16 = int_to_ptr.vmem [resolvable:$true] %s39_s16 }
   0x7   :  { %p2901_p1 = scmp.lt.u32.totalorder %s2897_s19, %s3601_s2 }
   0x9   :  { %p2903_p2 = pnand %p2901_p1, %p2898_p0 }
   0xb   :  { %2906 = shalt.err (!%p2903_p2)
}
   0xc   :  { %s2907_s9 = scalar_lea.vmem %s40_s16, 1024  ;;  %p2912_p4 = scmp.lt.s32.totalorder %s40_s16, %s40_s16 }
   0xd   :  { %p2908_p3 = scmp.ne.s32.totalorder %s40_s16, %s2907_s9  ;;  %p2913_p5 = scmp.lt.s32.totalorder %s2907_s9, %s2907_s9 }
   0xf   :  { %p2914_p6 = por %p2913_p5, %p2912_p4 }
  0x11   :  { %p2915_p7 = pnand %p2914_p6, %p2908_p3 }
  0x13   :  { %2918 = shalt.err (!%p2915_p7)
}
  0x14   :  { %s3014_s24 = smov 256   ;;  %s3015_s25 = smov 16  }
  0x15   :  { %45 = dma.hbm_to_vmem [thread:$0]  %s3601_s2, 1024, %s40_s16, [#allocation8], %s3014_s24, %s3014_s24, %s3015_s25  }
  0x16   :  { %s3016_s28 = smov [#allocation10]   ;;  %s3017_s30 = smov [#allocation5]  }
  0x17   :  { %s65_s29 = sshll.u32 %s3016_s28, 4  ;;  %s25_s11 = sshll.u32 %s3017_s30, 4  ;;  %s66_s29 = int_to_ptr.vmem [resolvable:$true] %s65_s29  ;;  %s26_s11 = int_to_ptr.vmem [resolvable:$true] %s25_s11 }
  0x18   :  { %s2919_s14 = scalar_lea.hbm %s3604_s5, 2048 }
  0x19   :  { %p2920_p8 = scmp.ne.s32.totalorder %s3604_s5, %s2919_s14  ;;  %p2923_p9 = scmp.lt.u32.totalorder %s2919_s14, %s3604_s5 }
  0x1b   :  { %p2925_p10 = pnand %p2923_p9, %p2920_p8 }
  0x1d   :  { %2928 = shalt.err (!%p2925_p10)
}
  0x1e   :  { %s2929_s2 = scalar_lea.vmem %s66_s29, 2048  ;;  %p2934_p12 = scmp.lt.s32.totalorder %s66_s29, %s66_s29 }
  0x1f   :  { %p2930_p11 = scmp.ne.s32.totalorder %s66_s29, %s2929_s2  ;;  %p2935_p13 = scmp.lt.s32.totalorder %s2929_s2, %s2929_s2 }
  0x21   :  { %p2936_p0 = por %p2935_p13, %p2934_p12 }
  0x23   :  { %p2937_p1 = pnand %p2936_p0, %p2930_p11 }
  0x25   :  { %2940 = shalt.err (!%p2937_p1)
}
  0x26   :  { %71 = dma.hbm_to_vmem [thread:$0]  %s3604_s5, 2048, %s66_s29, [#allocation11], %s3014_s24, %s3014_s24, %s3015_s25  }
  0x27   :  { %s2941_s23 = scalar_lea.hbm %s3599_s0, 256 }
  0x28   :  { %p2942_p2 = scmp.ne.s32.totalorder %s3599_s0, %s2941_s23  ;;  %p2945_p3 = scmp.lt.u32.totalorder %s2941_s23, %s3599_s0 }
  0x2a   :  { %p2947_p4 = pnand %p2945_p3, %p2942_p2 }
  0x2c   :  { %2950 = shalt.err (!%p2947_p4)
}
  0x2d   :  { %s2951_s30 = scalar_lea.vmem %s26_s11, 256  ;;  %p2956_p6 = scmp.lt.s32.totalorder %s26_s11, %s26_s11 }
  0x2e   :  { %p2952_p5 = scmp.ne.s32.totalorder %s26_s11, %s2951_s30  ;;  %p2957_p7 = scmp.lt.s32.totalorder %s2951_s30, %s2951_s30 }
  0x30   :  { %p2958_p8 = por %p2957_p7, %p2956_p6 }
  0x32   :  { %p2959_p9 = pnand %p2958_p8, %p2952_p5 }
  0x34   :  { %2962 = shalt.err (!%p2959_p9)
}
  0x35   :  { %s3018_s5 = smov 128   ;;  %s3019_s29 = smov 8  }
  0x36   :  { %31 = dma.hbm_to_vmem [thread:$0]  %s3599_s0, 256, %s26_s11, [#allocation6], %s3018_s5, %s3018_s5, %s3019_s29  }
  0x37   :  { %s3020_s14 = smov [#allocation9]   ;;  %s3021_s17 = smov [#allocation12]  }
  0x38   :  { %s51_s15 = sshll.u32 %s3020_s14, 4  ;;  %s77_s18 = sshll.u32 %s3021_s17, 4  ;;  %s52_s15 = int_to_ptr.vmem [resolvable:$true] %s51_s15  ;;  %s78_s18 = int_to_ptr.vmem [resolvable:$true] %s77_s18 }
  0x39   :  { %s2963_s16 = scalar_lea.hbm %s3602_s3, 2048 }
  0x3a   :  { %p2964_p10 = scmp.ne.s32.totalorder %s3602_s3, %s2963_s16  ;;  %p2967_p11 = scmp.lt.u32.totalorder %s2963_s16, %s3602_s3 }
  0x3c   :  { %p2969_p12 = pnand %p2967_p11, %p2964_p10 }
  0x3e   :  { %2972 = shalt.err (!%p2969_p12)
}
  0x3f   :  { %s2973_s0 = scalar_lea.vmem %s52_s15, 2048  ;;  %p2978_p0 = scmp.lt.s32.totalorder %s52_s15, %s52_s15 }
  0x40   :  { %p2974_p13 = scmp.ne.s32.totalorder %s52_s15, %s2973_s0  ;;  %p2979_p1 = scmp.lt.s32.totalorder %s2973_s0, %s2973_s0 }
  0x42   :  { %p2980_p2 = por %p2979_p1, %p2978_p0 }
  0x44   :  { %p2981_p3 = pnand %p2980_p2, %p2974_p13 }
  0x46   :  { %2984 = shalt.err (!%p2981_p3)
}
  0x47   :  { %57 = dma.hbm_to_vmem [thread:$0]  %s3602_s3, 2048, %s52_s15, [#allocation8], %s3014_s24, %s3014_s24, %s3015_s25  }
  0x48   :  { %s2985_s28 = scalar_lea.hbm %s3605_s6, 2048 }
  0x49   :  { %p2986_p4 = scmp.ne.s32.totalorder %s3605_s6, %s2985_s28  ;;  %p2989_p5 = scmp.lt.u32.totalorder %s2985_s28, %s3605_s6 }
  0x4b   :  { %p2991_p6 = pnand %p2989_p5, %p2986_p4 }
  0x4d   :  { %2994 = shalt.err (!%p2991_p6)
}
  0x4e   :  { %s2995_s13 = scalar_lea.vmem %s78_s18, 2048  ;;  %p3000_p8 = scmp.lt.s32.totalorder %s78_s18, %s78_s18 }
  0x4f   :  { %p2996_p7 = scmp.ne.s32.totalorder %s78_s18, %s2995_s13  ;;  %p3001_p9 = scmp.lt.s32.totalorder %s2995_s13, %s2995_s13 }
  0x51   :  { %p3002_p10 = por %p3001_p9, %p3000_p8 }
  0x53   :  { %p3003_p11 = pnand %p3002_p10, %p2996_p7 }
  0x55   :  { %3006 = shalt.err (!%p3003_p11)
}
  0x56   :  { %83 = dma.hbm_to_vmem [thread:$0]  %s3605_s6, 2048, %s78_s18, [#allocation11], %s3014_s24, %s3014_s24, %s3015_s25  }
  0x57   :  { %3007 = dma.done.wait [#allocation6], 256  }
  0x58   :  { %3008 = vsyncadd [#allocation6], 4294967040 }
  0x59   :  { %3009 = dma.done.wait [#allocation8], 3072  }
  0x5a   :  { %3010 = vsyncadd [#allocation8], 4294964224 }
  0x5b   :  { %3011 = dma.done.wait [#allocation11], 4096  }
  0x5c   :  { %3012 = vsyncadd [#allocation11], 4294963200  ;;  %v3022_v1 = vmov 0.0   ;;  %v122_v2 = vld [vmem:[#allocation7 + $0x8] sm:$0xff]  ;;  %v124_v3 = vld [vmem:[#allocation7 + $0x18] sm:$0xff]  ;;  %vm141_vm0 = vcmask 261120   ;;  %v107_v40 = vlaneseq }
  0x5d   :  { %212 = vmatprep.mubr.f32.mxu0 %v3022_v1  ;;  %325 = vmatprep.mubr.f32.mxu1 %v3022_v1  ;;  %v121_v4 = vld [vmem:[#allocation7] sm:$0xff]  ;;  %v2414_v5 = vpack.c.bf16 %v124_v3, %v122_v2  ;;  %v123_v6 = vld [vmem:[#allocation7 + $0x10] sm:$0xff]  ;;  %v126_v7 = vld [vmem:[#allocation7 + $0x28] sm:$0xff]  ;;  %vm360_vm3 = vcmask 254976   ;;  %vm362_vm4 = vcmask 517376   ;;  %vm257_vm5 = vcmask 523264  }
  0x5e   :  { %v128_v8 = vld [vmem:[#allocation7 + $0x38] sm:$0xff]  ;;  %v2416_v9 = vpack.c.bf16 %v123_v6, %v121_v4  ;;  %v125_v11 = vld [vmem:[#allocation7 + $0x20] sm:$0xff]  ;;  %v127_v12 = vld [vmem:[#allocation7 + $0x30] sm:$0xff]  ;;  %v108_v41 = vshrl.u32 %v107_v40, 7  ;;  %vm486_vm6 = vcmask 257026   ;;  %vm488_vm7 = vcmask 519426  }
  0x5f   :  { %v2418_v10 = vpack.c.bf16 %v128_v8, %v126_v7  ;;  %2415 = vmatprep.subr.bf16.mxu0 %v2414_v5  ;;  %v230_v13 = vld [vmem:[#allocation9 + $0x8] sm:$0xff]  ;;  %v232_v14 = vld [vmem:[#allocation9 + $0x18] sm:$0xff]  ;;  %v229_v15 = vld [vmem:[#allocation9] sm:$0xff]  ;;  %v2420_v16 = vpack.c.bf16 %v127_v12, %v125_v11  ;;  %vm744_vm8 = vcmask 261126   ;;  %vm746_vm9 = vcmask 523526  }
  0x60   :  { %2417 = vmatpush1.bf16.msra.mxu0 %v2416_v9  ;;  %v3156_v17 = vpack.c.bf16 %v232_v14, %v230_v13  ;;  %v231_v18 = vld [vmem:[#allocation9 + $0x10] sm:$0xff]  ;;  %v234_v19 = vld [vmem:[#allocation9 + $0x28] sm:$0xff]  ;;  %v236_v21 = vld [vmem:[#allocation9 + $0x38] sm:$0xff]  ;;  %v3204_v42 = vsub.s32 0, %v108_v41  ;;  %v3209_v44 = vsub.s32 1, %v108_v41  ;;  %vm615_vm10 = vcmask 259076  }
  0x61   :  { %2419 = vmatprep.subr.bf16.mxu0 %v2418_v10  ;;  %v3158_v20 = vpack.c.bf16 %v231_v18, %v229_v15  ;;  %v233_v22 = vld [vmem:[#allocation9 + $0x20] sm:$0xff]  ;;  %v235_v23 = vld [vmem:[#allocation9 + $0x30] sm:$0xff]  ;;  %v3161_v24 = vpack.c.bf16 %v236_v21, %v234_v19  ;;  %v238_v25 = vld [vmem:[#allocation9 + $0x48] sm:$0xff]  ;;  %vm617_vm11 = vcmask 521476   ;;  %vm2331_vm12 = vcmask 523270  }
  0x62   :  { %2423 = vmatprep.subr.bf16.mxu1 %v3156_v17  ;;  %v240_v26 = vld [vmem:[#allocation9 + $0x58] sm:$0xff]  ;;  %v3164_v27 = vpack.c.bf16 %v235_v23, %v233_v22  ;;  %v119_v28 = vld [vmem:[#allocation5] sm:$0xff]  ;;  %v237_v30 = vld [vmem:[#allocation9 + $0x40] sm:$0xff]  ;;  %vm2353_vm13 = vcmask 7174  }
  0x63   :  { %2425 = vmatpush1.bf16.msra.mxu1 %v3158_v20  ;;  %v3167_v29 = vpack.c.bf16 %v240_v26, %v238_v25  ;;  %v239_v31 = vld [vmem:[#allocation9 + $0x50] sm:$0xff]  ;;  %v242_v32 = vld [vmem:[#allocation9 + $0x68] sm:$0xff]  ;;  %v244_v33 = vld [vmem:[#allocation9 + $0x78] sm:$0xff] }
  0x64   :  { %2421 = vmatpush1.bf16.msra.mxu0 %v2420_v16  ;;  %2427 = vmatprep.subr.bf16.mxu1 %v3161_v24  ;;  %v3172_v34 = vpack.c.bf16 %v239_v31, %v237_v30  ;;  %v120_v35 = vld [vmem:[#allocation5 + $0x8] sm:$0xff]  ;;  %v3176_v36 = vpack.c.bf16 %v244_v33, %v242_v32  ;;  %v241_v37 = vld [vmem:[#allocation9 + $0x60] sm:$0xff]  ;;  %v243_v38 = vld [vmem:[#allocation9 + $0x70] sm:$0xff] }
  0x65   :  { %2439 = vmatprep.subr.bf16.mxu0 %v3156_v17  ;;  %v3182_v39 = vpack.c.bf16 %v243_v38, %v241_v37  ;;  %v129_v43 = vld [vmem:[%s3603_s4] sm:$0x3] }
  0x66   :  { %v134_v45 = vrot.slane %v129_v43, %v3204_v42  ;;  %v138_v46 = vrot.slane %v129_v43, %v3209_v44  ;;  %v105_v55 = vld [vmem:[%s3600_s1] sm:$0x3]  ;;  %s3023_s1 = smov 64  }
  0x67   :  { %2362 = vmatmul.mubr.msk.f32.vlgmr.msra.gmra.mrb[0].mxu0 %vm141_vm0, %v119_v28  ;;  %2429 = vmatpush1.bf16.msra.mxu1 %v3164_v27  ;;  %v110_v57 = vrot.slane %v105_v55, %v3204_v42  ;;  %v114_v4 = vrot.slane %v105_v55, %v3209_v44 }
  0x68   :  { %218 = vmatprep.mubr.f32.mxu0 %v3022_v1  ;;  %2431 = vmatprep.subr.bf16.mxu1 %v3167_v29 }
  0x69   :  { %2441 = vmatpush1.bf16.msra.mxu0 %v3158_v20  ;;  %vm3217_vm1 = vcmp.gt.f32.partialorder %v110_v57, 0.5  ;;  %vm3224_vm2 = vcmp.gt.f32.partialorder %v114_v4, 0.5 }
  0x6a   :  { %2443 = vmatprep.subr.bf16.mxu0 %v3161_v24 }
  0x6b   :  { %2363 = vmatmul.mubr.msk.f32.gmra.mrb[2].mxu0 %vm141_vm0, %v120_v35  ;;  %2433 = vmatpush1.bf16.msra.mxu1 %v3172_v34 }
  0x6c   :  { %2435 = vmatprep.subr.bf16.mxu1 %v3176_v36  ;;  %442 = vmatprep.mubr.f32.mxu0 %v3022_v1 }
  0x6d   :  { %2445 = vmatpush1.bf16.msra.mxu0 %v3164_v27 }
  0x6e   :  { %2447 = vmatprep.subr.bf16.mxu0 %v3167_v29 }
  0x6f   :  { %2437 = vmatpush1.bf16.msra.mxu1 %v3182_v39 }
  0x70   :  { %2455 = vmatprep.subr.bf16.mxu1 %v3156_v17 }
  0x71   :  { %2449 = vmatpush1.bf16.msra.mxu0 %v3172_v34 }
  0x72   :  { %326 = vmatmul.mubr.f32.vlgmr.msra.gmra.mrb[0].mxu1 %v3022_v1  ;;  %2451 = vmatprep.subr.bf16.mxu0 %v3176_v36 }
  0x73   :  { %2457 = vmatpush1.bf16.msra.mxu1 %v3158_v20  ;;  %571 = vmatprep.mubr.f32.mxu1 %v3022_v1 }
  0x74   :  { %2459 = vmatprep.subr.bf16.mxu1 %v3161_v24 }
  0x75   :  { %2453 = vmatpush1.bf16.msra.mxu0 %v3182_v39 }
  0x76   :  { %2471 = vmatprep.subr.bf16.mxu0 %v3156_v17 }
  0x77   :  { %2461 = vmatpush1.bf16.msra.mxu1 %v3164_v27 }
  0x78   :  { %2463 = vmatprep.subr.bf16.mxu1 %v3167_v29 }
  0x7b   :  { %2465 = vmatpush1.bf16.msra.mxu1 %v3172_v34 }
  0x7c   :  { %2467 = vmatprep.subr.bf16.mxu1 %v3176_v36 }
  0x7f   :  { %2469 = vmatpush1.bf16.msra.mxu1 %v3182_v39 }
  0x80   :  { %2487 = vmatprep.subr.bf16.mxu1 %v3156_v17 }
 0x13a   :  { %v214_v47 = vpop.f32.mrb[0].mxu0 }
 0x13b   :  { %v215_v48 = vadd.f32 %v214_v47, %v134_v45  ;;  %v216_v49 = vpop.f32.mrb[1].mxu0 }
 0x13c   :  { %v217_v50 = vadd.f32 %v216_v49, %v138_v46 }
 0x13d   :  { %225 = vst [vmem:[#allocation2] sm:$0xff] %v215_v48 }
 0x13e   :  { %226 = vst [vmem:[#allocation2 + $0x8] sm:$0xff] %v217_v50  ;;  %v220_v51 = vpop.f32.mrb[2].mxu0 }
 0x13f   :  { %v221_v52 = vadd.f32 %v220_v51, %v134_v45  ;;  %v222_v53 = vpop.f32.mrb[3].mxu0 }
 0x140   :  { %v223_v54 = vadd.f32 %v222_v53, %v138_v46 }
 0x141   :  { %227 = vst [vmem:[#allocation2 + $0x10] sm:$0xff] %v221_v52 }
 0x142   :  { %228 = vst [vmem:[#allocation2 + $0x18] sm:$0xff] %v223_v54 }
 0x144   :  { %v245_v62 = vld [vmem:[#allocation2] sm:$0x3]  ;;  %v364_v33 = vld [vmem:[#allocation2] sm:$0xc] }
 0x145   :  { %v327_v56 = vpop.f32.mrb[0].mxu1  ;;  %v246_v7 = vld [vmem:[#allocation2 + $0x8] sm:$0x3]  ;;  %v365_v47 = vld [vmem:[#allocation2 + $0x8] sm:$0xc] }
 0x146   :  { %v329_v58 = vpop.f32.mrb[1].mxu1 }
 0x148   :  { %v247_v59 = vld [vmem:[#allocation2 + $0x10] sm:$0xc0]  ;;  %v366_v30 = vld [vmem:[#allocation2 + $0x10] sm:$0x30] }
 0x149   :  { %v251_v60 = vrot.slane %v247_v59, 6  ;;  %v248_v3 = vld [vmem:[#allocation2 + $0x18] sm:$0xc0]  ;;  %v370_v31 = vrot.slane %v366_v30, 2  ;;  %v367_v43 = vld [vmem:[#allocation2 + $0x18] sm:$0x30] }
 0x14a   :  { %v252_v5 = vrot.slane %v248_v3, 6  ;;  %v371_v45 = vrot.slane %v367_v43, 2 }
 0x14b   :  { %v255_v63 = vsel %vm3217_vm1, %v245_v62, %v251_v60  ;;  %v374_v38 = vsel %vm3217_vm1, %v364_v33, %v370_v31 }
 0x14c   :  { %v332_v0 = vadd.f32 %v327_v56, %v255_v63  ;;  %v256_v8 = vsel %vm3224_vm2, %v246_v7, %v252_v5  ;;  %v375_v48 = vsel %vm3224_vm2, %v365_v47, %v371_v45  ;;  %v492_v5 = vld [vmem:[#allocation2 + $0x10] sm:$0xc] }
 0x14d   :  { %v333_v9 = vadd.f32 %v329_v58, %v256_v8  ;;  %v496_v7 = vrot.slane %v492_v5, 6 }
 0x14e   :  { %v2364_v2 = vmul.f32 -1.442695, %v332_v0 }
 0x14f   :  { %v2365_v15 = vmul.f32 -1.442695, %v333_v9 }
 0x150   :  { %2705 = vpow2.f32 %v2364_v2 }
 0x151   :  { %2707 = vtanh.f32 %v333_v9  ;;  %v490_v9 = vld [vmem:[#allocation2] sm:$0x30] }
 0x15a   :  { %v2706_v10 = vpop.eup %2705 }
 0x15b   :  { %v340_v11 = vadd.f32 1.0, %v2706_v10  ;;  %v2708_v12 = vpop.eup %2707 }
 0x15d   :  { %2709 = vrcp.f32 %v340_v11 }
 0x15e   :  { %2711 = vpow2.f32 %v2365_v15  ;;  %v493_v15 = vld [vmem:[#allocation2 + $0x18] sm:$0xc] }
 0x167   :  { %v2710_v13 = vpop.eup %2709 }
 0x168   :  { %v348_v14 = vmul.f32 %v2710_v13, %v2708_v12  ;;  %v2712_v16 = vpop.eup %2711  ;;  %v347_v19 = vmul.f32 0.0, %v2710_v13  ;;  %v500_v12 = vsel %vm3217_vm1, %v490_v9, %v496_v7 }
 0x169   :  { %v341_v18 = vadd.f32 1.0, %v2712_v16  ;;  %v497_v16 = vrot.slane %v493_v15, 6 }
 0x16a   :  { %350 = vrot.lane.b32.xlu0 %v348_v14, %s3023_s1 }
 0x16b   :  { %2713 = vrcp.f32 %v341_v18 }
 0x175   :  { %v2714_v23 = vpop.eup %2713 }
 0x1dc   :  { %v351_v21 = vpop.permute.xlu0 %350 }
 0x1dd   :  { %v353_v22 = vadd.f32 %v351_v21, %v347_v19  ;;  %v491_v19 = vld [vmem:[#allocation2 + $0x8] sm:$0x30] }
 0x1de   :  { %v501_v21 = vsel %vm3224_vm2, %v491_v19, %v497_v16 }
 0x1df   :  { %2715 = vtanh.f32 %v353_v22  ;;  %v471_v53 = vrot.slane %v353_v22, 6 }
 0x1e9   :  { %v2716_v25 = vpop.eup %2715 }
 0x1ea   :  { %v355_v26 = vmul.f32 %v2716_v25, %v2714_v23 }
 0x1ec   :  { %357 = vrot.lane.b32.xlu0 %v355_v26, %s3023_s1 }
 0x25e   :  { %v358_v28 = vpop.permute.xlu0 %357 }
 0x25f   :  { %361 = vst.msk [vmem:[#allocation3] sm:$0x3] %vm360_vm3, %v358_v28  ;;  %2366 = vmatmul.mubr.msk.f32.vlgmr.msra.gmra.mrb[4].mxu0 %vm257_vm5, %v358_v28 }
 0x260   :  { %363 = vst.msk [vmem:[#allocation3 + $0xe] sm:$0x3] %vm362_vm4, %v358_v28  ;;  %2473 = vmatpush1.bf16.msra.mxu0 %v3158_v20  ;;  %700 = vmatprep.mubr.f32.mxu0 %v3022_v1 }
 0x261   :  { %2475 = vmatprep.subr.bf16.mxu0 %v3161_v24 }
 0x264   :  { %2477 = vmatpush1.bf16.msra.mxu0 %v3164_v27 }
 0x265   :  { %2479 = vmatprep.subr.bf16.mxu0 %v3167_v29 }
 0x268   :  { %2481 = vmatpush1.bf16.msra.mxu0 %v3172_v34 }
 0x269   :  { %2483 = vmatprep.subr.bf16.mxu0 %v3176_v36 }
 0x26c   :  { %2485 = vmatpush1.bf16.msra.mxu0 %v3182_v39 }
 0x26d   :  { %2503 = vmatprep.subr.bf16.mxu0 %v3156_v17 }
 0x332   :  { %v444_v32 = vpop.f32.mrb[4].mxu0 }
 0x333   :  { %v451_v35 = vrot.slane %v444_v32, 6  ;;  %v446_v37 = vpop.f32.mrb[5].mxu0 }
 0x334   :  { %v452_v46 = vrot.slane %v446_v37, 6 }
 0x335   :  { %v455_v40 = vadd.f32 %v451_v35, %v374_v38 }
 0x336   :  { %v456_v49 = vadd.f32 %v452_v46, %v375_v48  ;;  %v621_v48 = vld [vmem:[#allocation2 + $0x10] sm:$0x3] }
 0x337   :  { %v2367_v41 = vmul.f32 -1.442695, %v455_v40 }
 0x338   :  { %v2368_v57 = vmul.f32 -1.442695, %v456_v49 }
 0x339   :  { %2717 = vpow2.f32 %v2367_v41 }
 0x33a   :  { %2719 = vtanh.f32 %v456_v49  ;;  %v625_v49 = vrot.slane %v621_v48, 2 }
 0x343   :  { %v2718_v50 = vpop.eup %2717 }
 0x344   :  { %v463_v51 = vadd.f32 1.0, %v2718_v50  ;;  %v2720_v52 = vpop.eup %2719 }
 0x346   :  { %2721 = vrcp.f32 %v463_v51  ;;  %v619_v51 = vld [vmem:[#allocation2] sm:$0xc0] }
 0x347   :  { %2723 = vpow2.f32 %v2368_v57  ;;  %v622_v57 = vld [vmem:[#allocation2 + $0x18] sm:$0x3] }
 0x350   :  { %v2722_v54 = vpop.eup %2721 }
 0x351   :  { %v474_v55 = vmul.f32 %v2722_v54, %v2720_v52  ;;  %v473_v56 = vmul.f32 %v2722_v54, %v471_v53  ;;  %v2724_v58 = vpop.eup %2723  ;;  %v629_v54 = vsel %vm3217_vm1, %v619_v51, %v625_v49 }
 0x352   :  { %v464_v59 = vadd.f32 1.0, %v2724_v58  ;;  %v626_v58 = vrot.slane %v622_v57, 2 }
 0x353   :  { %476 = vrot.lane.b32.xlu1 %v474_v55, %s3023_s1 }
 0x354   :  { %2725 = vrcp.f32 %v464_v59 }
 0x35e   :  { %v2726_v63 = vpop.eup %2725 }
 0x3c5   :  { %v477_v60 = vpop.permute.xlu1 %476 }
 0x3c6   :  { %v479_v62 = vadd.f32 %v477_v60, %v473_v56  ;;  %v620_v60 = vld [vmem:[#allocation2 + $0x8] sm:$0xc0] }
 0x3c8   :  { %2727 = vtanh.f32 %v479_v62  ;;  %v600_v28 = vrot.slane %v479_v62, 6  ;;  %v630_v62 = vsel %vm3224_vm2, %v620_v60, %v626_v58  ;;  %v869_v60 = vld [vmem:[#allocation2 + $0x10] sm:$0xc] }
 0x3d2   :  { %v2728_v0 = vpop.eup %2727 }
 0x3d3   :  { %v3249_v2 = vmul.f32 %v2728_v0, %v2726_v63 }
 0x3d5   :  { %v502_v3 = vrot.slane %v3249_v2, 2 }
 0x3d7   :  { %503 = vrot.lane.b32.xlu1 %v502_v3, %s3023_s1 }
 0x449   :  { %v504_v4 = vpop.permute.xlu1 %503 }
 0x44a   :  { %2369 = vmatmul.mubr.msk.f32.vlgmr.msra.gmra.mrb[2].mxu1 %vm257_vm5, %v504_v4 }
 0x44b   :  { %2489 = vmatpush1.bf16.msra.mxu1 %v3158_v20  ;;  %829 = vmatprep.mubr.f32.mxu1 %v3022_v1 }
 0x44c   :  { %2491 = vmatprep.subr.bf16.mxu1 %v3161_v24 }
 0x44f   :  { %2493 = vmatpush1.bf16.msra.mxu1 %v3164_v27 }
 0x450   :  { %2495 = vmatprep.subr.bf16.mxu1 %v3167_v29 }
 0x453   :  { %2497 = vmatpush1.bf16.msra.mxu1 %v3172_v34 }
 0x454   :  { %2499 = vmatprep.subr.bf16.mxu1 %v3176_v36 }
 0x457   :  { %2501 = vmatpush1.bf16.msra.mxu1 %v3182_v39 }
 0x458   :  { %2519 = vmatprep.subr.bf16.mxu1 %v3156_v17 }
 0x51d   :  { %v573_v8 = vpop.f32.mrb[2].mxu1 }
 0x51e   :  { %v580_v10 = vrot.slane %v573_v8, 4  ;;  %v575_v11 = vpop.f32.mrb[3].mxu1 }
 0x51f   :  { %v581_v18 = vrot.slane %v575_v11, 4 }
 0x520   :  { %v584_v13 = vadd.f32 %v580_v10, %v500_v12 }
 0x521   :  { %v585_v22 = vadd.f32 %v581_v18, %v501_v21  ;;  %v750_v21 = vld [vmem:[#allocation2] sm:$0xc0] }
 0x522   :  { %v2370_v14 = vmul.f32 -1.442695, %v584_v13 }
 0x523   :  { %v2371_v33 = vmul.f32 -1.442695, %v585_v22 }
 0x524   :  { %2729 = vpow2.f32 %v2370_v14 }
 0x525   :  { %2731 = vtanh.f32 %v585_v22  ;;  %v748_v22 = vld [vmem:[#allocation2 + $0x10] sm:$0x3] }
 0x52e   :  { %v2730_v23 = vpop.eup %2729 }
 0x52f   :  { %v592_v25 = vadd.f32 1.0, %v2730_v23  ;;  %v2732_v26 = vpop.eup %2731  ;;  %v754_v23 = vrot.slane %v750_v21, 6 }
 0x531   :  { %2733 = vrcp.f32 %v592_v25  ;;  %v758_v25 = vsel %vm3217_vm1, %v748_v22, %v754_v23 }
 0x532   :  { %2735 = vpow2.f32 %v2371_v33  ;;  %v749_v33 = vld [vmem:[#allocation2 + $0x18] sm:$0x3] }
 0x53b   :  { %v2734_v30 = vpop.eup %2733 }
 0x53c   :  { %v603_v31 = vmul.f32 %v2734_v30, %v2732_v26  ;;  %v602_v32 = vmul.f32 %v2734_v30, %v600_v28  ;;  %v2736_v35 = vpop.eup %2735 }
 0x53d   :  { %v593_v37 = vadd.f32 1.0, %v2736_v35 }
 0x53e   :  { %605 = vrot.lane.b32.xlu0 %v603_v31, %s3023_s1 }
 0x53f   :  { %2737 = vrcp.f32 %v593_v37 }
 0x549   :  { %v2738_v41 = vpop.eup %2737 }
 0x5b0   :  { %v606_v38 = vpop.permute.xlu0 %605 }
 0x5b1   :  { %v608_v40 = vadd.f32 %v606_v38, %v602_v32  ;;  %v751_v32 = vld [vmem:[#allocation2 + $0x8] sm:$0xc0] }
 0x5b2   :  { %v755_v35 = vrot.slane %v751_v32, 6 }
 0x5b3   :  { %2739 = vtanh.f32 %v608_v40  ;;  %v729_v4 = vrot.slane %v608_v40, 6 }
 0x5b4   :  { %v759_v37 = vsel %vm3224_vm2, %v749_v33, %v755_v35 }
 0x5bd   :  { %v2740_v43 = vpop.eup %2739 }
 0x5be   :  { %v3268_v45 = vmul.f32 %v2740_v43, %v2738_v41 }
 0x5c0   :  { %v631_v46 = vrot.slane %v3268_v45, 4 }
 0x5c2   :  { %632 = vrot.lane.b32.xlu1 %v631_v46, %s3023_s1 }
 0x634   :  { %v633_v47 = vpop.permute.xlu1 %632 }
 0x635   :  { %2372 = vmatmul.mubr.msk.f32.vlgmr.msra.gmra.mrb[6].mxu0 %vm257_vm5, %v633_v47 }
 0x636   :  { %2505 = vmatpush1.bf16.msra.mxu0 %v3158_v20  ;;  %947 = vmatprep.mubr.f32.mxu0 %v3022_v1 }
 0x637   :  { %2507 = vmatprep.subr.bf16.mxu0 %v3161_v24 }
 0x63a   :  { %2509 = vmatpush1.bf16.msra.mxu0 %v3164_v27 }
 0x63b   :  { %2511 = vmatprep.subr.bf16.mxu0 %v3167_v29 }
 0x63e   :  { %2513 = vmatpush1.bf16.msra.mxu0 %v3172_v34 }
 0x63f   :  { %2515 = vmatprep.subr.bf16.mxu0 %v3176_v36 }
 0x642   :  { %2517 = vmatpush1.bf16.msra.mxu0 %v3182_v39 }
 0x643   :  { %2535 = vmatprep.subr.bf16.mxu0 %v3156_v17 }
 0x708   :  { %v702_v50 = vpop.f32.mrb[6].mxu0 }
 0x709   :  { %v709_v52 = vrot.slane %v702_v50, 2  ;;  %v704_v53 = vpop.f32.mrb[7].mxu0 }
 0x70a   :  { %v710_v59 = vrot.slane %v704_v53, 2 }
 0x70b   :  { %v713_v55 = vadd.f32 %v709_v52, %v629_v54 }
 0x70c   :  { %v714_v17 = vadd.f32 %v710_v59, %v630_v62  ;;  %v871_v59 = vld [vmem:[#allocation2] sm:$0x30] }
 0x70d   :  { %v2373_v56 = vmul.f32 -1.442695, %v713_v55  ;;  %v875_v62 = vrot.slane %v871_v59, 2 }
 0x70e   :  { %v2374_v9 = vmul.f32 -1.442695, %v714_v17 }
 0x70f   :  { %2741 = vpow2.f32 %v2373_v56 }
 0x710   :  { %2743 = vtanh.f32 %v714_v17 }
 0x719   :  { %v2742_v63 = vpop.eup %2741 }
 0x71a   :  { %v721_v0 = vadd.f32 1.0, %v2742_v63  ;;  %v2744_v3 = vpop.eup %2743 }
 0x71c   :  { %2745 = vrcp.f32 %v721_v0  ;;  %v879_v0 = vsel %vm3217_vm1, %v869_v60, %v875_v62 }
 0x71d   :  { %2747 = vpow2.f32 %v2374_v9 }
 0x726   :  { %v2746_v5 = vpop.eup %2745 }
 0x727   :  { %v732_v7 = vmul.f32 %v2746_v5, %v2744_v3  ;;  %v731_v8 = vmul.f32 %v2746_v5, %v729_v4  ;;  %v2748_v10 = vpop.eup %2747 }
 0x728   :  { %v722_v11 = vadd.f32 1.0, %v2748_v10 }
 0x729   :  { %734 = vrot.lane.b32.xlu0 %v732_v7, %s3023_s1 }
 0x72a   :  { %2749 = vrcp.f32 %v722_v11 }
 0x734   :  { %v2750_v14 = vpop.eup %2749 }
 0x79b   :  { %v735_v12 = vpop.permute.xlu0 %734 }
 0x79c   :  { %v737_v13 = vadd.f32 %v735_v12, %v731_v8 }
 0x79e   :  { %2751 = vtanh.f32 %v737_v13  ;;  %v852_v46 = vrot.slane %v737_v13, 6 }
 0x7a8   :  { %v2752_v15 = vpop.eup %2751 }
 0x7a9   :  { %v3287_v16 = vmul.f32 %v2752_v15, %v2750_v14 }
 0x7ab   :  { %v760_v18 = vrot.slane %v3287_v16, 6 }
 0x7ad   :  { %761 = vrot.lane.b32.xlu1 %v760_v18, %s3023_s1 }
 0x81f   :  { %v762_v19 = vpop.permute.xlu1 %761 }
 0x820   :  { %2375 = vmatmul.mubr.msk.f32.vlgmr.msra.gmra.mrb[4].mxu1 %vm257_vm5, %v762_v19 }
 0x821   :  { %2521 = vmatpush1.bf16.msra.mxu1 %v3158_v20  ;;  %1074 = vmatprep.mubr.f32.mxu1 %v3022_v1 }
 0x822   :  { %2523 = vmatprep.subr.bf16.mxu1 %v3161_v24 }
 0x825   :  { %2525 = vmatpush1.bf16.msra.mxu1 %v3164_v27 }
 0x826   :  { %2527 = vmatprep.subr.bf16.mxu1 %v3167_v29 }
 0x829   :  { %2529 = vmatpush1.bf16.msra.mxu1 %v3172_v34 }
 0x82a   :  { %2531 = vmatprep.subr.bf16.mxu1 %v3176_v36 }
 0x82d   :  { %2533 = vmatpush1.bf16.msra.mxu1 %v3182_v39 }
 0x8f3   :  { %v831_v26 = vpop.f32.mrb[4].mxu1 }
 0x8f4   :  { %v836_v28 = vadd.f32 %v831_v26, %v758_v25  ;;  %v833_v30 = vpop.f32.mrb[5].mxu1 }
 0x8f5   :  { %v837_v38 = vadd.f32 %v833_v30, %v759_v37  ;;  %v993_v30 = vld [vmem:[#allocation2 + $0x10] sm:$0x30] }
 0x8f6   :  { %v2376_v31 = vmul.f32 -1.442695, %v836_v28  ;;  %v995_v28 = vld [vmem:[#allocation2] sm:$0xc] }
 0x8f7   :  { %v2377_v50 = vmul.f32 -1.442695, %v837_v38 }
 0x8f8   :  { %2753 = vpow2.f32 %v2376_v31  ;;  %v999_v31 = vrot.slane %v995_v28, 6  ;;  %v1250_v28 = vld [vmem:[#allocation10 + $0x8] sm:$0xff] }
 0x8f9   :  { %2755 = vtanh.f32 %v837_v38 }
 0x8fa   :  { %v1003_v37 = vsel %vm3217_vm1, %v993_v30, %v999_v31  ;;  %v1252_v30 = vld [vmem:[#allocation10 + $0x18] sm:$0xff]  ;;  %v1249_v31 = vld [vmem:[#allocation10] sm:$0xff] }
 0x902   :  { %v2754_v40 = vpop.eup %2753 }
 0x903   :  { %v844_v41 = vadd.f32 1.0, %v2754_v40  ;;  %v2756_v43 = vpop.eup %2755 }
 0x905   :  { %2757 = vrcp.f32 %v844_v41  ;;  %v996_v41 = vld [vmem:[#allocation2 + $0x8] sm:$0xc] }
 0x906   :  { %2759 = vpow2.f32 %v2377_v50 }
 0x90f   :  { %v2758_v47 = vpop.eup %2757 }
 0x910   :  { %v855_v48 = vmul.f32 %v2758_v47, %v2756_v43  ;;  %v854_v49 = vmul.f32 %v2758_v47, %v852_v46  ;;  %v2760_v51 = vpop.eup %2759  ;;  %v994_v43 = vld [vmem:[#allocation2 + $0x18] sm:$0x30]  ;;  %v1000_v47 = vrot.slane %v996_v41, 6  ;;  %v1253_v41 = vld [vmem:[#allocation10 + $0x20] sm:$0xff] }
 0x911   :  { %v845_v52 = vadd.f32 1.0, %v2760_v51 }
 0x912   :  { %857 = vrot.lane.b32.xlu0 %v855_v48, %s3023_s1  ;;  %v1004_v48 = vsel %vm3224_vm2, %v994_v43, %v1000_v47  ;;  %v1255_v43 = vld [vmem:[#allocation10 + $0x30] sm:$0xff] }
 0x913   :  { %2761 = vrcp.f32 %v845_v52 }
 0x91d   :  { %v2762_v55 = vpop.eup %2761 }
 0x984   :  { %v858_v53 = vpop.permute.xlu0 %857 }
 0x985   :  { %v860_v54 = vadd.f32 %v858_v53, %v854_v49 }
 0x987   :  { %2763 = vtanh.f32 %v860_v54  ;;  %v976_v9 = vrot.slane %v860_v54, 6 }
 0x991   :  { %v2764_v56 = vpop.eup %2763 }
 0x992   :  { %v862_v57 = vmul.f32 %v2764_v56, %v2762_v55 }
 0x994   :  { %864 = vrot.lane.b32.xlu1 %v862_v57, %s3023_s1 }
 0xa06   :  { %v3306_v58 = vpop.permute.xlu1 %864 }
 0xa07   :  { %2378 = vmatmul.mubr.msk.f32.vlgmr.msra.gmra.mrb[8].mxu0 %vm257_vm5, %v3306_v58 }
 0xa08   :  { %2537 = vmatpush1.bf16.msra.mxu0 %v3158_v20  ;;  %1201 = vmatprep.mubr.f32.mxu0 %v3022_v1 }
 0xa09   :  { %2539 = vmatprep.subr.bf16.mxu0 %v3161_v24 }
 0xa0c   :  { %2541 = vmatpush1.bf16.msra.mxu0 %v3164_v27  ;;  %v872_v27 = vld [vmem:[#allocation2 + $0x8] sm:$0x30] }
 0xa0d   :  { %2543 = vmatprep.subr.bf16.mxu0 %v3167_v29  ;;  %v870_v29 = vld [vmem:[#allocation2 + $0x18] sm:$0xc] }
 0xa10   :  { %2545 = vmatpush1.bf16.msra.mxu0 %v3172_v34  ;;  %v876_v34 = vrot.slane %v872_v27, 2 }
 0xa11   :  { %2547 = vmatprep.subr.bf16.mxu0 %v3176_v36 }
 0xa12   :  { %v880_v36 = vsel %vm3224_vm2, %v870_v29, %v876_v34  ;;  %v1122_v29 = vld [vmem:[#allocation2] sm:$0x3] }
 0xa13   :  { %v1126_v34 = vrot.slane %v1122_v29, 2 }
 0xa14   :  { %2549 = vmatpush1.bf16.msra.mxu0 %v3182_v39 }
 0xada   :  { %v949_v17 = vpop.f32.mrb[8].mxu0 }
 0xadb   :  { %v956_v63 = vrot.slane %v949_v17, 6  ;;  %v951_v20 = vpop.f32.mrb[9].mxu0 }
 0xadc   :  { %v957_v4 = vrot.slane %v951_v20, 6 }
 0xadd   :  { %v960_v24 = vadd.f32 %v956_v63, %v879_v0 }
 0xade   :  { %v961_v39 = vadd.f32 %v957_v4, %v880_v36  ;;  %v1120_v4 = vld [vmem:[#allocation2 + $0x10] sm:$0xc0] }
 0xadf   :  { %v2379_v3 = vmul.f32 -1.442695, %v960_v24 }
 0xae0   :  { %v2380_v13 = vmul.f32 -1.442695, %v961_v39 }
 0xae1   :  { %2765 = vpow2.f32 %v2379_v3 }
 0xae2   :  { %2767 = vtanh.f32 %v961_v39 }
 0xaeb   :  { %v2766_v5 = vpop.eup %2765 }
 0xaec   :  { %v968_v7 = vadd.f32 1.0, %v2766_v5  ;;  %v2768_v8 = vpop.eup %2767 }
 0xaee   :  { %2769 = vrcp.f32 %v968_v7  ;;  %v1130_v7 = vsel %vm3217_vm1, %v1120_v4, %v1126_v34 }
 0xaef   :  { %2771 = vpow2.f32 %v2380_v13 }
 0xaf8   :  { %v2770_v10 = vpop.eup %2769 }
 0xaf9   :  { %v979_v11 = vmul.f32 %v2770_v10, %v2768_v8  ;;  %v978_v12 = vmul.f32 %v2770_v10, %v976_v9  ;;  %v2772_v14 = vpop.eup %2771  ;;  %v1121_v10 = vld [vmem:[#allocation2 + $0x18] sm:$0xc0] }
 0xafa   :  { %v969_v15 = vadd.f32 1.0, %v2772_v14 }
 0xafb   :  { %981 = vrot.lane.b32.xlu0 %v979_v11, %s3023_s1 }
 0xafc   :  { %2773 = vrcp.f32 %v969_v15 }
 0xb06   :  { %v2774_v21 = vpop.eup %2773 }
 0xb6d   :  { %v982_v18 = vpop.permute.xlu0 %981 }
 0xb6e   :  { %v984_v19 = vadd.f32 %v982_v18, %v978_v12 }
 0xb70   :  { %2775 = vtanh.f32 %v984_v19  ;;  %v1103_v53 = vrot.slane %v984_v19, 6 }
 0xb7a   :  { %v2776_v22 = vpop.eup %2775 }
 0xb7b   :  { %v3323_v23 = vmul.f32 %v2776_v22, %v2774_v21 }
 0xb7d   :  { %v1005_v25 = vrot.slane %v3323_v23, 2 }
 0xb7f   :  { %1006 = vrot.lane.b32.xlu1 %v1005_v25, %s3023_s1 }
 0xbf1   :  { %v1007_v26 = vpop.permute.xlu1 %1006 }
 0xbf2   :  { %2381 = vmatmul.mubr.msk.f32.vlgmr.msra.gmra.mrb[6].mxu1 %vm257_vm5, %v1007_v26 }
 0xbf3   :  { %1347 = vmatprep.mubr.f32.mxu1 %v3022_v1 }
 0xcc5   :  { %v1076_v32 = vpop.f32.mrb[6].mxu1 }
 0xcc6   :  { %v1083_v33 = vrot.slane %v1076_v32, 4  ;;  %v1078_v35 = vpop.f32.mrb[7].mxu1  ;;  %v2550_v32 = vpack.c.bf16 %v1252_v30, %v1250_v28 }
 0xcc7   :  { %v1084_v46 = vrot.slane %v1078_v35, 4  ;;  %v1254_v35 = vld [vmem:[#allocation10 + $0x28] sm:$0xff] }
 0xcc8   :  { %v1087_v38 = vadd.f32 %v1083_v33, %v1003_v37  ;;  %v1251_v33 = vld [vmem:[#allocation10 + $0x10] sm:$0xff]  ;;  %v1256_v37 = vld [vmem:[#allocation10 + $0x38] sm:$0xff]  ;;  %2551 = vmatprep.subr.bf16.mxu1 %v2550_v32 }
 0xcc9   :  { %v1088_v49 = vadd.f32 %v1084_v46, %v1004_v48  ;;  %v2556_v46 = vpack.c.bf16 %v1255_v43, %v1253_v41 }
 0xcca   :  { %v2382_v40 = vmul.f32 -1.442695, %v1087_v38  ;;  %v2552_v38 = vpack.c.bf16 %v1251_v33, %v1249_v31  ;;  %v1265_v33 = vld [vmem:[%s3606_s7] sm:$0x3] }
 0xccb   :  { %v2383_v57 = vmul.f32 -1.442695, %v1088_v49 }
 0xccc   :  { %2777 = vpow2.f32 %v2382_v40  ;;  %v2554_v40 = vpack.c.bf16 %v1256_v37, %v1254_v35  ;;  %2553 = vmatpush1.bf16.msra.mxu1 %v2552_v38  ;;  %v1270_v35 = vrot.slane %v1265_v33, %v3204_v42  ;;  %v1274_v37 = vrot.slane %v1265_v33, %v3209_v44 }
 0xccd   :  { %2779 = vtanh.f32 %v1088_v49 }
 0xcce   :  { %2555 = vmatprep.subr.bf16.mxu1 %v2554_v40 }
 0xcd0   :  { %2557 = vmatpush1.bf16.msra.mxu1 %v2556_v46 }
 0xcd6   :  { %v2778_v50 = vpop.eup %2777 }
 0xcd7   :  { %v1095_v51 = vadd.f32 1.0, %v2778_v50  ;;  %v2780_v52 = vpop.eup %2779 }
 0xcd9   :  { %2781 = vrcp.f32 %v1095_v51 }
 0xcda   :  { %2783 = vpow2.f32 %v2383_v57  ;;  %v1262_v57 = vld [vmem:[#allocation10 + $0x68] sm:$0xff] }
 0xce3   :  { %v2782_v54 = vpop.eup %2781 }
 0xce4   :  { %v1106_v55 = vmul.f32 %v2782_v54, %v2780_v52  ;;  %v1105_v56 = vmul.f32 %v2782_v54, %v1103_v53  ;;  %v2784_v59 = vpop.eup %2783  ;;  %v1260_v52 = vld [vmem:[#allocation10 + $0x58] sm:$0xff]  ;;  %v1257_v53 = vld [vmem:[#allocation10 + $0x40] sm:$0xff] }
 0xce5   :  { %v1096_v60 = vadd.f32 1.0, %v2784_v59  ;;  %v1264_v59 = vld [vmem:[#allocation10 + $0x78] sm:$0xff] }
 0xce6   :  { %1108 = vrot.lane.b32.xlu0 %v1106_v55, %s3023_s1 }
 0xce7   :  { %2785 = vrcp.f32 %v1096_v60  ;;  %v2562_v60 = vpack.c.bf16 %v1264_v59, %v1262_v57 }
 0xcf1   :  { %v2786_v63 = vpop.eup %2785 }
 0xd58   :  { %v1109_v62 = vpop.permute.xlu0 %1108 }
 0xd59   :  { %v1111_v17 = vadd.f32 %v1109_v62, %v1105_v56  ;;  %v1259_v56 = vld [vmem:[#allocation10 + $0x50] sm:$0xff]  ;;  %v1261_v62 = vld [vmem:[#allocation10 + $0x60] sm:$0xff] }
 0xd5b   :  { %2787 = vtanh.f32 %v1111_v17  ;;  %v1230_v21 = vrot.slane %v1111_v17, 6  ;;  %v1263_v17 = vld [vmem:[#allocation10 + $0x70] sm:$0xff] }
 0xd65   :  { %v2788_v20 = vpop.eup %2787 }
 0xd66   :  { %v1113_v0 = vmul.f32 %v2788_v20, %v2786_v63  ;;  %v2564_v63 = vpack.c.bf16 %v1263_v17, %v1261_v62 }
 0xd68   :  { %v1132_v24 = vrot.slane %v1113_v0, 4 }
 0xd6a   :  { %1133 = vrot.lane.b32.xlu1 %v1132_v24, %s3023_s1  ;;  %v1367_v24 = vld [vmem:[#allocation12 + $0x18] sm:$0xff] }
 0xd6e   :  { %483 = vrot.lane.b32.xlu1 %v3249_v2, %s3023_s1 }
 0xd72   :  { %741 = vrot.lane.b32.xlu1 %v3287_v16, %s3023_s1 }
 0xd76   :  { %1115 = vrot.lane.b32.xlu1 %v1113_v0, %s3023_s1  ;;  %v1365_v0 = vld [vmem:[#allocation12 + $0x8] sm:$0xff] }
 0xddc   :  { %v1134_v3 = vpop.permute.xlu1 %1133 }
 0xddd   :  { %2384 = vmatmul.mubr.msk.f32.vlgmr.msra.gmra.mrb[10].mxu0 %vm257_vm5, %v1134_v3  ;;  %v1364_v3 = vld [vmem:[#allocation12] sm:$0xff] }
 0xdde   :  { %1456 = vmatprep.mubr.f32.mxu0 %v3022_v1 }
 0xde0   :  { %v484_v27 = vpop.permute.xlu1 %483 }
 0xde1   :  { %487 = vst.msk [vmem:[#allocation3] sm:$0xc] %vm486_vm6, %v484_v27 }
 0xde2   :  { %489 = vst.msk [vmem:[#allocation3 + $0xa] sm:$0xc] %vm488_vm7, %v484_v27 }
 0xde4   :  { %v742_v2 = vpop.permute.xlu1 %741 }
 0xde5   :  { %745 = vst.msk [vmem:[#allocation3] sm:$0xc0] %vm744_vm8, %v742_v2 }
 0xde6   :  { %747 = vst.msk [vmem:[#allocation3 + $0x2] sm:$0xc0] %vm746_vm9, %v742_v2  ;;  %v3365_v2 = vpack.c.bf16 %v1367_v24, %v1365_v0 }
 0xde7   :  { %867 = vst.msk [vmem:[#allocation3 + $0x8] sm:$0x3] %vm360_vm3, %v3306_v58 }
 0xde8   :  { %868 = vst.msk [vmem:[#allocation3 + $0x6] sm:$0x3] %vm362_vm4, %v3306_v58  ;;  %v1116_v16 = vpop.permute.xlu1 %1115  ;;  %v1123_v58 = vld [vmem:[#allocation2 + $0x8] sm:$0x3]  ;;  %2567 = vmatprep.subr.bf16.mxu0 %v3365_v2 }
 0xde9   :  { %1118 = vst.msk [vmem:[#allocation3 + $0x8] sm:$0x30] %vm615_vm10, %v1116_v16  ;;  %v1127_v12 = vrot.slane %v1123_v58, 2  ;;  %v1375_v58 = vld [vmem:[#allocation12 + $0x58] sm:$0xff] }
 0xdea   :  { %1119 = vst.msk [vmem:[#allocation3 - $0x2] sm:$0x30] %vm617_vm11, %v1116_v16  ;;  %v1366_v16 = vld [vmem:[#allocation12 + $0x10] sm:$0xff] }
 0xdeb   :  { %v1131_v13 = vsel %vm3224_vm2, %v1121_v10, %v1127_v12  ;;  %v3367_v4 = vpack.c.bf16 %v1366_v16, %v1364_v3  ;;  %v1372_v12 = vld [vmem:[#allocation12 + $0x40] sm:$0xff] }
 0xded   :  { %2569 = vmatpush1.bf16.msra.mxu0 %v3367_v4 }
 0xeb0   :  { %v1203_v36 = vpop.f32.mrb[10].mxu0 }
 0xeb1   :  { %v1210_v39 = vrot.slane %v1203_v36, 2  ;;  %v1205_v5 = vpop.f32.mrb[11].mxu0  ;;  %v1369_v36 = vld [vmem:[#allocation12 + $0x28] sm:$0xff] }
 0xeb2   :  { %v1211_v11 = vrot.slane %v1205_v5, 2  ;;  %v1368_v5 = vld [vmem:[#allocation12 + $0x20] sm:$0xff] }
 0xeb3   :  { %v1214_v8 = vadd.f32 %v1210_v39, %v1130_v7  ;;  %v1371_v39 = vld [vmem:[#allocation12 + $0x38] sm:$0xff] }
 0xeb4   :  { %v1215_v14 = vadd.f32 %v1211_v11, %v1131_v13  ;;  %v3376_v7 = vpack.c.bf16 %v1371_v39, %v1369_v36  ;;  %v1374_v13 = vld [vmem:[#allocation12 + $0x50] sm:$0xff] }
 0xeb5   :  { %v2385_v9 = vmul.f32 -1.442695, %v1214_v8  ;;  %v1370_v8 = vld [vmem:[#allocation12 + $0x30] sm:$0xff] }
 0xeb6   :  { %v2386_v47 = vmul.f32 -1.442695, %v1215_v14  ;;  %v3378_v10 = vpack.c.bf16 %v1370_v8, %v1368_v5  ;;  %2571 = vmatprep.subr.bf16.mxu0 %v3376_v7 }
 0xeb7   :  { %2789 = vpow2.f32 %v2385_v9  ;;  %v1373_v9 = vld [vmem:[#allocation12 + $0x48] sm:$0xff] }
 0xeb8   :  { %2791 = vtanh.f32 %v1215_v14  ;;  %v3380_v11 = vpack.c.bf16 %v1375_v58, %v1373_v9  ;;  %v1377_v14 = vld [vmem:[#allocation12 + $0x68] sm:$0xff]  ;;  %2573 = vmatpush1.bf16.msra.mxu0 %v3378_v10 }
 0xeba   :  { %2575 = vmatprep.subr.bf16.mxu0 %v3380_v11 }
 0xec1   :  { %v2790_v15 = vpop.eup %2789 }
 0xec2   :  { %v1222_v18 = vadd.f32 1.0, %v2790_v15  ;;  %v2792_v19 = vpop.eup %2791  ;;  %v1379_v15 = vld [vmem:[#allocation12 + $0x78] sm:$0xff] }
 0xec4   :  { %2793 = vrcp.f32 %v1222_v18  ;;  %v3384_v18 = vpack.c.bf16 %v1374_v13, %v1372_v12 }
 0xec5   :  { %2795 = vpow2.f32 %v2386_v47 }
 0xec6   :  { %2577 = vmatpush1.bf16.msra.mxu0 %v3384_v18 }
 0xece   :  { %v2794_v22 = vpop.eup %2793 }
 0xecf   :  { %v1233_v25 = vmul.f32 %v2794_v22, %v2792_v19  ;;  %v1232_v26 = vmul.f32 %v2794_v22, %v1230_v21  ;;  %v2796_v48 = vpop.eup %2795  ;;  %v3387_v19 = vpack.c.bf16 %v1379_v15, %v1377_v14  ;;  %v1376_v21 = vld [vmem:[#allocation12 + $0x60] sm:$0xff]  ;;  %v1378_v22 = vld [vmem:[#allocation12 + $0x70] sm:$0xff] }
 0xed0   :  { %v1223_v49 = vadd.f32 1.0, %v2796_v48 }
 0xed1   :  { %1235 = vrot.lane.b32.xlu0 %v1233_v25, %s3023_s1  ;;  %v3390_v25 = vpack.c.bf16 %v1378_v22, %v1376_v21  ;;  %2579 = vmatprep.subr.bf16.mxu0 %v3387_v19 }
 0xed2   :  { %2797 = vrcp.f32 %v1223_v49 }
 0xed3   :  { %2581 = vmatpush1.bf16.msra.mxu0 %v3390_v25 }
 0xed4   :  { %2599 = vmatprep.subr.bf16.mxu0 %v3365_v2 }
 0xed5   :  { %612 = vrot.lane.b32.xlu0 %v3268_v45, %s3023_s1  ;;  %v1258_v45 = vld [vmem:[#allocation10 + $0x48] sm:$0xff] }
 0xed6   :  { %v2558_v55 = vpack.c.bf16 %v1260_v52, %v1258_v45  ;;  %1457 = vmatmul.mubr.f32.vlgmr.msra.gmra.mrb[12].mxu0 %v3022_v1 }
 0xed7   :  { %2601 = vmatpush1.bf16.msra.mxu0 %v3367_v4  ;;  %1690 = vmatprep.mubr.f32.mxu0 %v3022_v1 }
 0xed8   :  { %2559 = vmatprep.subr.bf16.mxu1 %v2558_v55  ;;  %2603 = vmatprep.subr.bf16.mxu0 %v3376_v7 }
 0xed9   :  { %988 = vrot.lane.b32.xlu0 %v3323_v23, %s3023_s1  ;;  %v2560_v23 = vpack.c.bf16 %v1259_v56, %v1257_v53 }
 0xedb   :  { %2561 = vmatpush1.bf16.msra.mxu1 %v2560_v23  ;;  %2605 = vmatpush1.bf16.msra.mxu0 %v3378_v10 }
 0xedc   :  { %2563 = vmatprep.subr.bf16.mxu1 %v2562_v60  ;;  %v2798_v27 = vpop.eup %2797  ;;  %2607 = vmatprep.subr.bf16.mxu0 %v3380_v11 }
 0xedf   :  { %2565 = vmatpush1.bf16.msra.mxu1 %v2564_v63  ;;  %2609 = vmatpush1.bf16.msra.mxu0 %v3384_v18 }
 0xee0   :  { %2583 = vmatprep.subr.bf16.mxu1 %v3365_v2  ;;  %2611 = vmatprep.subr.bf16.mxu0 %v3387_v19 }
 0xee3   :  { %2613 = vmatpush1.bf16.msra.mxu0 %v3390_v25 }
 0xee4   :  { %2631 = vmatprep.subr.bf16.mxu0 %v3365_v2 }
 0xf43   :  { %v1236_v50 = vpop.permute.xlu0 %1235 }
 0xf44   :  { %v1238_v51 = vadd.f32 %v1236_v50, %v1232_v26 }
 0xf46   :  { %2799 = vtanh.f32 %v1238_v51 }
 0xf47   :  { %v613_v54 = vpop.permute.xlu0 %612 }
 0xf48   :  { %616 = vst.msk [vmem:[#allocation3] sm:$0x30] %vm615_vm10, %v613_v54 }
 0xf49   :  { %618 = vst.msk [vmem:[#allocation3 + $0x6] sm:$0x30] %vm617_vm11, %v613_v54 }
 0xf4b   :  { %v989_v20 = vpop.permute.xlu0 %988 }
 0xf4c   :  { %991 = vst.msk [vmem:[#allocation3 + $0x8] sm:$0xc] %vm486_vm6, %v989_v20 }
 0xf4d   :  { %992 = vst.msk [vmem:[#allocation3 + $0x2] sm:$0xc] %vm488_vm7, %v989_v20 }
 0xf50   :  { %v2800_v29 = vpop.eup %2799 }
 0xf51   :  { %v3369_v34 = vmul.f32 %v2800_v29, %v2798_v27 }
 0xf53   :  { %1242 = vrot.lane.b32.xlu0 %v3369_v34, %s3023_s1 }
 0xfa9   :  { %v1458_v31 = vpop.f32.mrb[12].mxu0 }
 0xfaa   :  { %v1460_v32 = vpop.f32.mrb[13].mxu0 }
 0xfc5   :  { %v1243_v26 = vpop.permute.xlu0 %1242 }
 0xfc6   :  { %1245 = vst.msk [vmem:[#allocation3 + $0x8] sm:$0xc0] %vm744_vm8, %v1243_v26 }
 0xfc7   :  { %1246 = vst.msk [vmem:[#allocation3 - $0x6] sm:$0xc0] %vm746_vm9, %v1243_v26 }
 0xfcd   :  { %v1248_v30 = vld [vmem:[#allocation3 + $0x8] sm:$0xff] }
 0xfce   :  { %v1247_v28 = vld [vmem:[#allocation3] sm:$0xff] }
 0xfcf   :  { %2387 = vmatmul.mubr.msk.f32.vlgmr.msra.gmra.mrb[8].mxu1 %vm257_vm5, %v1247_v28 }
 0xfd0   :  { %1353 = vmatprep.mubr.f32.mxu1 %v3022_v1  ;;  %2585 = vmatpush1.bf16.msra.mxu1 %v3367_v4 }
 0xfd1   :  { %2587 = vmatprep.subr.bf16.mxu1 %v3376_v7 }
 0xfd3   :  { %2388 = vmatmul.mubr.msk.f32.gmra.mrb[10].mxu1 %vm257_vm5, %v1248_v30 }
 0xfd4   :  { %2589 = vmatpush1.bf16.msra.mxu1 %v3378_v10  ;;  %1568 = vmatprep.mubr.f32.mxu1 %v3022_v1 }
 0xfd5   :  { %2591 = vmatprep.subr.bf16.mxu1 %v3380_v11 }
 0xfd8   :  { %2593 = vmatpush1.bf16.msra.mxu1 %v3384_v18 }
 0xfd9   :  { %2595 = vmatprep.subr.bf16.mxu1 %v3387_v19 }
 0xfdc   :  { %2597 = vmatpush1.bf16.msra.mxu1 %v3390_v25 }
 0xfdd   :  { %2615 = vmatprep.subr.bf16.mxu1 %v3365_v2 }
0x10a2   :  { %v1349_v38 = vpop.f32.mrb[8].mxu1 }
0x10a3   :  { %v1350_v40 = vadd.f32 %v1349_v38, %v1270_v35  ;;  %v1351_v41 = vpop.f32.mrb[9].mxu1 }
0x10a4   :  { %v1352_v43 = vadd.f32 %v1351_v41, %v1274_v37 }
0x10a5   :  { %1360 = vst [vmem:[#allocation2] sm:$0xff] %v1350_v40 }
0x10a6   :  { %1361 = vst [vmem:[#allocation2 + $0x8] sm:$0xff] %v1352_v43  ;;  %v1355_v46 = vpop.f32.mrb[10].mxu1 }
0x10a7   :  { %v1356_v47 = vadd.f32 %v1355_v46, %v1270_v35  ;;  %v1357_v48 = vpop.f32.mrb[11].mxu1 }
0x10a8   :  { %v1358_v49 = vadd.f32 %v1357_v48, %v1274_v37 }
0x10a9   :  { %1362 = vst [vmem:[#allocation2 + $0x10] sm:$0xff] %v1356_v47 }
0x10aa   :  { %1363 = vst [vmem:[#allocation2 + $0x18] sm:$0xff] %v1358_v49 }
0x10ac   :  { %v3424_v50 = vld [vmem:[#allocation2] sm:$0xc]  ;;  %v3426_v51 = vld [vmem:[#allocation2] sm:$0x30]  ;;  %v1380_v45 = vld [vmem:[#allocation2] sm:$0x3] }
0x10ad   :  { %v2083_v42 = vrot.slane %v3424_v50, 6  ;;  %v1966_v44 = vrot.slane %v3426_v51, 2  ;;  %v3430_v52 = vld [vmem:[#allocation2 + $0x8] sm:$0x30]  ;;  %v3436_v57 = vld [vmem:[#allocation2] sm:$0xc0] }
0x10ae   :  { %v3438_v59 = vld [vmem:[#allocation2 + $0x8] sm:$0xc0]  ;;  %v2201_v62 = vrot.slane %v1380_v45, 2  ;;  %v1381_v17 = vld [vmem:[#allocation2 + $0x8] sm:$0x3]  ;;  %v1967_v16 = vrot.slane %v3430_v52, 2 }
0x10af   :  { %v3450_v63 = vld [vmem:[#allocation2 + $0x8] sm:$0xc]  ;;  %v1854_v29 = vrot.slane %v3436_v57, 6  ;;  %v1855_v36 = vrot.slane %v3438_v59, 6  ;;  %v2202_v5 = vrot.slane %v1381_v17, 2 }
0x10b0   :  { %v1382_v53 = vld [vmem:[#allocation2 + $0x10] sm:$0xc0]  ;;  %v3432_v54 = vld [vmem:[#allocation2 + $0x10] sm:$0x30]  ;;  %v3434_v55 = vld [vmem:[#allocation2 + $0x10] sm:$0xc] }
0x10b1   :  { %v1386_v56 = vrot.slane %v1382_v53, 6  ;;  %v3443_v23 = vsel %vm3217_vm1, %v3434_v55, %v1966_v44  ;;  %v3448_v60 = vsel %vm3217_vm1, %v3432_v54, %v2083_v42  ;;  %v3454_v0 = vld [vmem:[#allocation2 + $0x18] sm:$0xc]  ;;  %v3456_v24 = vld [vmem:[#allocation2 + $0x10] sm:$0x3]  ;;  %v2084_v9 = vrot.slane %v3450_v63, 6 }
0x10b2   :  { %v3458_v3 = vld [vmem:[#allocation2 + $0x18] sm:$0x3]  ;;  %v1383_v39 = vld [vmem:[#allocation2 + $0x18] sm:$0xc0]  ;;  %v1490_v8 = vld [vmem:[#allocation2 + $0x18] sm:$0x30]  ;;  %v3467_v12 = vsel %vm3217_vm1, %v3456_v24, %v1854_v29  ;;  %v3477_v14 = vsel %vm3224_vm2, %v3454_v0, %v1967_v16  ;;  %v3485_v21 = vsel %vm3217_vm1, %v1382_v53, %v2201_v62 }
0x10b3   :  { %v1390_v20 = vsel %vm3217_vm1, %v1380_v45, %v1386_v56  ;;  %v3472_v13 = vsel %vm3224_vm2, %v3458_v3, %v1855_v36  ;;  %v3481_v15 = vsel %vm3224_vm2, %v1490_v8, %v2084_v9  ;;  %v3489_v22 = vsel %vm3224_vm2, %v1383_v39, %v2202_v5 }
0x10b4   :  { %v1463_v27 = vadd.f32 %v1458_v31, %v1390_v20  ;;  %v1387_v26 = vrot.slane %v1383_v39, 6  ;;  %v1493_v44 = vrot.slane %v3432_v54, 2  ;;  %v1494_v16 = vrot.slane %v1490_v8, 2 }
0x10b6   :  { %v2389_v58 = vmul.f32 -1.442695, %v1463_v27  ;;  %v1391_v28 = vsel %vm3224_vm2, %v1381_v17, %v1387_v26  ;;  %v1497_v17 = vsel %vm3217_vm1, %v3424_v50, %v1493_v44  ;;  %v1498_v36 = vsel %vm3224_vm2, %v3450_v63, %v1494_v16 }
0x10b7   :  { %v1464_v30 = vadd.f32 %v1460_v32, %v1391_v28 }
0x10b8   :  { %2801 = vpow2.f32 %v2389_v58 }
0x10b9   :  { %2803 = vtanh.f32 %v1464_v30  ;;  %v2390_v40 = vmul.f32 -1.442695, %v1464_v30 }
0x10c2   :  { %v2802_v31 = vpop.eup %2801 }
0x10c3   :  { %v1471_v33 = vadd.f32 1.0, %v2802_v31  ;;  %v2804_v35 = vpop.eup %2803 }
0x10c5   :  { %2805 = vrcp.f32 %v1471_v33 }
0x10c6   :  { %2807 = vpow2.f32 %v2390_v40 }
0x10cf   :  { %v2806_v37 = vpop.eup %2805 }
0x10d0   :  { %v1479_v38 = vmul.f32 %v2806_v37, %v2804_v35  ;;  %v2808_v41 = vpop.eup %2807  ;;  %v1478_v46 = vmul.f32 0.0, %v2806_v37 }
0x10d1   :  { %v1472_v43 = vadd.f32 1.0, %v2808_v41 }
0x10d2   :  { %1481 = vrot.lane.b32.xlu1 %v1479_v38, %s3023_s1 }
0x10d3   :  { %2809 = vrcp.f32 %v1472_v43  ;;  %v1614_v43 = vrot.slane %v3434_v55, 6 }
0x10dd   :  { %v2810_v49 = vpop.eup %2809 }
0x1144   :  { %v1482_v47 = vpop.permute.xlu1 %1481 }
0x1145   :  { %v1484_v48 = vadd.f32 %v1482_v47, %v1478_v46 }
0x1147   :  { %2811 = vtanh.f32 %v1484_v48  ;;  %v1597_v58 = vrot.slane %v1484_v48, 6 }
0x1151   :  { %v2812_v32 = vpop.eup %2811 }
0x1152   :  { %v1486_v45 = vmul.f32 %v2812_v32, %v2810_v49  ;;  %v1618_v49 = vsel %vm3217_vm1, %v3426_v51, %v1614_v43 }
0x1154   :  { %1500 = vrot.lane.b32.xlu0 %v1486_v45, %s3023_s1 }
0x11c6   :  { %v1501_v42 = vpop.permute.xlu0 %1500 }
0x11c7   :  { %2391 = vmatmul.mubr.msk.f32.vlgmr.msra.gmra.mrb[12].mxu1 %vm257_vm5, %v1501_v42  ;;  %v1615_v42 = vrot.slane %v3454_v0, 6 }
0x11c8   :  { %2617 = vmatpush1.bf16.msra.mxu1 %v3367_v4  ;;  %1812 = vmatprep.mubr.f32.mxu1 %v3022_v1 }
0x11c9   :  { %2619 = vmatprep.subr.bf16.mxu1 %v3376_v7 }
0x11cc   :  { %2621 = vmatpush1.bf16.msra.mxu1 %v3378_v10 }
0x11cd   :  { %2623 = vmatprep.subr.bf16.mxu1 %v3380_v11 }
0x11d0   :  { %2625 = vmatpush1.bf16.msra.mxu1 %v3384_v18 }
0x11d1   :  { %2627 = vmatprep.subr.bf16.mxu1 %v3387_v19 }
0x11d4   :  { %2629 = vmatpush1.bf16.msra.mxu1 %v3390_v25 }
0x11d5   :  { %2647 = vmatprep.subr.bf16.mxu1 %v3365_v2 }
0x129a   :  { %v1570_v53 = vpop.f32.mrb[12].mxu1 }
0x129b   :  { %v1577_v56 = vrot.slane %v1570_v53, 6  ;;  %v1572_v62 = vpop.f32.mrb[13].mxu1  ;;  %v1619_v53 = vsel %vm3224_vm2, %v3430_v52, %v1615_v42 }
0x129c   :  { %v1578_v29 = vrot.slane %v1572_v62, 6 }
0x129d   :  { %v1581_v20 = vadd.f32 %v1577_v56, %v1497_v17 }
0x129e   :  { %v1582_v39 = vadd.f32 %v1578_v29, %v1498_v36 }
0x129f   :  { %v2392_v27 = vmul.f32 -1.442695, %v1581_v20 }
0x12a0   :  { %v2393_v50 = vmul.f32 -1.442695, %v1582_v39 }
0x12a1   :  { %2813 = vpow2.f32 %v2392_v27 }
0x12a2   :  { %2815 = vtanh.f32 %v1582_v39 }
0x12ab   :  { %v2814_v5 = vpop.eup %2813 }
0x12ac   :  { %v1589_v9 = vadd.f32 1.0, %v2814_v5  ;;  %v2816_v54 = vpop.eup %2815 }
0x12ae   :  { %2817 = vrcp.f32 %v1589_v9 }
0x12af   :  { %2819 = vpow2.f32 %v2393_v50 }
0x12b8   :  { %v2818_v26 = vpop.eup %2817 }
0x12b9   :  { %v1600_v28 = vmul.f32 %v2818_v26, %v2816_v54  ;;  %v1599_v30 = vmul.f32 %v2818_v26, %v1597_v58  ;;  %v2820_v8 = vpop.eup %2819 }
0x12ba   :  { %v1590_v31 = vadd.f32 1.0, %v2820_v8 }
0x12bb   :  { %1602 = vrot.lane.b32.xlu1 %v1600_v28, %s3023_s1  ;;  %v1736_v28 = vrot.slane %v3456_v24, 2 }
0x12bc   :  { %2821 = vrcp.f32 %v1590_v31 }
0x12bd   :  { %v1740_v31 = vsel %vm3217_vm1, %v3436_v57, %v1736_v28 }
0x12c6   :  { %v2822_v63 = vpop.eup %2821 }
0x132d   :  { %v1603_v33 = vpop.permute.xlu1 %1602 }
0x132e   :  { %v1605_v35 = vadd.f32 %v1603_v33, %v1599_v30 }
0x1330   :  { %2823 = vtanh.f32 %v1605_v35  ;;  %v1719_v20 = vrot.slane %v1605_v35, 6 }
0x133a   :  { %v2824_v37 = vpop.eup %2823 }
0x133b   :  { %v1607_v38 = vmul.f32 %v2824_v37, %v2822_v63  ;;  %v1737_v63 = vrot.slane %v3458_v3, 2 }
0x133d   :  { %v1621_v40 = vrot.slane %v1607_v38, 2  ;;  %v1741_v38 = vsel %vm3224_vm2, %v3438_v59, %v1737_v63 }
0x133f   :  { %1622 = vrot.lane.b32.xlu0 %v1621_v40, %s3023_s1 }
0x13b1   :  { %v1623_v41 = vpop.permute.xlu0 %1622 }
0x13b2   :  { %2394 = vmatmul.mubr.msk.f32.vlgmr.msra.gmra.mrb[14].mxu0 %vm257_vm5, %v1623_v41 }
0x13b3   :  { %2633 = vmatpush1.bf16.msra.mxu0 %v3367_v4  ;;  %1930 = vmatprep.mubr.f32.mxu0 %v3022_v1 }
0x13b4   :  { %2635 = vmatprep.subr.bf16.mxu0 %v3376_v7 }
0x13b7   :  { %2637 = vmatpush1.bf16.msra.mxu0 %v3378_v10 }
0x13b8   :  { %2639 = vmatprep.subr.bf16.mxu0 %v3380_v11 }
0x13bb   :  { %2641 = vmatpush1.bf16.msra.mxu0 %v3384_v18 }
0x13bc   :  { %2643 = vmatprep.subr.bf16.mxu0 %v3387_v19 }
0x13bf   :  { %2645 = vmatpush1.bf16.msra.mxu0 %v3390_v25 }
0x13c0   :  { %2663 = vmatprep.subr.bf16.mxu0 %v3365_v2 }
0x1485   :  { %v1692_v46 = vpop.f32.mrb[14].mxu0 }
0x1486   :  { %v1699_v47 = vrot.slane %v1692_v46, 4  ;;  %v1694_v48 = vpop.f32.mrb[15].mxu0 }
0x1487   :  { %v1700_v44 = vrot.slane %v1694_v48, 4 }
0x1488   :  { %v1703_v32 = vadd.f32 %v1699_v47, %v1618_v49 }
0x1489   :  { %v1704_v56 = vadd.f32 %v1700_v44, %v1619_v53 }
0x148a   :  { %v2395_v45 = vmul.f32 -1.442695, %v1703_v32 }
0x148b   :  { %v2396_v29 = vmul.f32 -1.442695, %v1704_v56 }
0x148c   :  { %2825 = vpow2.f32 %v2395_v45 }
0x148d   :  { %2827 = vtanh.f32 %v1704_v56 }
0x1496   :  { %v2826_v62 = vpop.eup %2825 }
0x1497   :  { %v1711_v55 = vadd.f32 1.0, %v2826_v62  ;;  %v2828_v17 = vpop.eup %2827 }
0x1499   :  { %2829 = vrcp.f32 %v1711_v55 }
0x149a   :  { %2831 = vpow2.f32 %v2396_v29 }
0x14a3   :  { %v2830_v27 = vpop.eup %2829 }
0x14a4   :  { %v1722_v16 = vmul.f32 %v2830_v27, %v2828_v17  ;;  %v1721_v51 = vmul.f32 %v2830_v27, %v1719_v20  ;;  %v2832_v0 = vpop.eup %2831 }
0x14a5   :  { %v1712_v36 = vadd.f32 1.0, %v2832_v0 }
0x14a6   :  { %1724 = vrot.lane.b32.xlu1 %v1722_v16, %s3023_s1 }
0x14a7   :  { %2833 = vrcp.f32 %v1712_v36 }
0x14b1   :  { %v2834_v52 = vpop.eup %2833 }
0x1518   :  { %v1725_v39 = vpop.permute.xlu1 %1724 }
0x1519   :  { %v1727_v5 = vadd.f32 %v1725_v39, %v1721_v51 }
0x151b   :  { %2835 = vtanh.f32 %v1727_v5  ;;  %v1841_v43 = vrot.slane %v1727_v5, 6 }
0x1525   :  { %v2836_v9 = vpop.eup %2835 }
0x1526   :  { %v1729_v54 = vmul.f32 %v2836_v9, %v2834_v52 }
0x1528   :  { %v1743_v58 = vrot.slane %v1729_v54, 4 }
0x152a   :  { %1744 = vrot.lane.b32.xlu0 %v1743_v58, %s3023_s1 }
0x159c   :  { %v1745_v26 = vpop.permute.xlu0 %1744 }
0x159d   :  { %2397 = vmatmul.mubr.msk.f32.vlgmr.msra.gmra.mrb[14].mxu1 %vm257_vm5, %v1745_v26 }
0x159e   :  { %2649 = vmatpush1.bf16.msra.mxu1 %v3367_v4  ;;  %2041 = vmatprep.mubr.f32.mxu1 %v3022_v1 }
0x159f   :  { %2651 = vmatprep.subr.bf16.mxu1 %v3376_v7 }
0x15a2   :  { %2653 = vmatpush1.bf16.msra.mxu1 %v3378_v10 }
0x15a3   :  { %2655 = vmatprep.subr.bf16.mxu1 %v3380_v11 }
0x15a6   :  { %2657 = vmatpush1.bf16.msra.mxu1 %v3384_v18 }
0x15a7   :  { %2659 = vmatprep.subr.bf16.mxu1 %v3387_v19 }
0x15aa   :  { %2661 = vmatpush1.bf16.msra.mxu1 %v3390_v25 }
0x15ab   :  { %2679 = vmatprep.subr.bf16.mxu1 %v3365_v2 }
0x1670   :  { %v1814_v30 = vpop.f32.mrb[14].mxu1 }
0x1671   :  { %v1821_v50 = vrot.slane %v1814_v30, 2  ;;  %v1816_v8 = vpop.f32.mrb[15].mxu1 }
0x1672   :  { %v1822_v37 = vrot.slane %v1816_v8, 2 }
0x1673   :  { %v1825_v33 = vadd.f32 %v1821_v50, %v1740_v31 }
0x1674   :  { %v1826_v2 = vadd.f32 %v1822_v37, %v1741_v38 }
0x1675   :  { %v2398_v35 = vmul.f32 -1.442695, %v1825_v33 }
0x1676   :  { %v2399_v47 = vmul.f32 -1.442695, %v1826_v2 }
0x1677   :  { %2837 = vpow2.f32 %v2398_v35 }
0x1678   :  { %2839 = vtanh.f32 %v1826_v2 }
0x1681   :  { %v2838_v40 = vpop.eup %2837 }
0x1682   :  { %v1833_v24 = vadd.f32 1.0, %v2838_v40  ;;  %v2840_v41 = vpop.eup %2839 }
0x1684   :  { %2841 = vrcp.f32 %v1833_v24 }
0x1685   :  { %2843 = vpow2.f32 %v2399_v47 }
0x168e   :  { %v2842_v46 = vpop.eup %2841 }
0x168f   :  { %v1844_v61 = vmul.f32 %v2842_v46, %v2840_v41  ;;  %v1843_v57 = vmul.f32 %v2842_v46, %v1841_v43  ;;  %v2844_v3 = vpop.eup %2843 }
0x1690   :  { %v1834_v48 = vadd.f32 1.0, %v2844_v3 }
0x1691   :  { %1846 = vrot.lane.b32.xlu1 %v1844_v61, %s3023_s1 }
0x1692   :  { %2845 = vrcp.f32 %v1834_v48 }
0x169c   :  { %v2846_v6 = vpop.eup %2845 }
0x1703   :  { %v1847_v49 = vpop.permute.xlu1 %1846 }
0x1704   :  { %v1849_v32 = vadd.f32 %v1847_v49, %v1843_v57 }
0x1706   :  { %2847 = vtanh.f32 %v1849_v32  ;;  %v1953_v51 = vrot.slane %v1849_v32, 6 }
0x1710   :  { %v2848_v59 = vpop.eup %2847 }
0x1711   :  { %v1851_v45 = vmul.f32 %v2848_v59, %v2846_v6 }
0x1713   :  { %v1861_v42 = vrot.slane %v1851_v45, 6 }
0x1715   :  { %1862 = vrot.lane.b32.xlu0 %v1861_v42, %s3023_s1 }
0x1787   :  { %v1863_v44 = vpop.permute.xlu0 %1862 }
0x1788   :  { %2400 = vmatmul.mubr.msk.f32.vlgmr.msra.gmra.mrb[16].mxu0 %vm257_vm5, %v1863_v44 }
0x1789   :  { %2665 = vmatpush1.bf16.msra.mxu0 %v3367_v4  ;;  %2159 = vmatprep.mubr.f32.mxu0 %v3022_v1 }
0x178a   :  { %2667 = vmatprep.subr.bf16.mxu0 %v3376_v7 }
0x178d   :  { %2669 = vmatpush1.bf16.msra.mxu0 %v3378_v10 }
0x178e   :  { %2671 = vmatprep.subr.bf16.mxu0 %v3380_v11 }
0x1791   :  { %2673 = vmatpush1.bf16.msra.mxu0 %v3384_v18 }
0x1792   :  { %2675 = vmatprep.subr.bf16.mxu0 %v3387_v19 }
0x1795   :  { %2677 = vmatpush1.bf16.msra.mxu0 %v3390_v25 }
0x185b   :  { %v1932_v53 = vpop.f32.mrb[16].mxu0 }
0x185c   :  { %v1937_v56 = vadd.f32 %v1932_v53, %v3467_v12  ;;  %v1934_v62 = vpop.f32.mrb[17].mxu0 }
0x185d   :  { %v1938_v55 = vadd.f32 %v1934_v62, %v3472_v13 }
0x185e   :  { %v2401_v17 = vmul.f32 -1.442695, %v1937_v56 }
0x185f   :  { %v2402_v39 = vmul.f32 -1.442695, %v1938_v55 }
0x1860   :  { %2849 = vpow2.f32 %v2401_v17 }
0x1861   :  { %2851 = vtanh.f32 %v1938_v55 }
0x186a   :  { %v2850_v20 = vpop.eup %2849 }
0x186b   :  { %v1945_v27 = vadd.f32 1.0, %v2850_v20  ;;  %v2852_v16 = vpop.eup %2851 }
0x186d   :  { %2853 = vrcp.f32 %v1945_v27 }
0x186e   :  { %2855 = vpow2.f32 %v2402_v39 }
0x1877   :  { %v2854_v29 = vpop.eup %2853 }
0x1878   :  { %v1956_v0 = vmul.f32 %v2854_v29, %v2852_v16  ;;  %v1955_v36 = vmul.f32 %v2854_v29, %v1953_v51  ;;  %v2856_v5 = vpop.eup %2855  ;;  %v2412_v16 = vld [vmem:[%s3607_s8] ss:$0 sm:$0xff] }
0x1879   :  { %v1946_v12 = vadd.f32 1.0, %v2856_v5 }
0x187a   :  { %1958 = vrot.lane.b32.xlu1 %v1956_v0, %s3023_s1 }
0x187b   :  { %2857 = vrcp.f32 %v1946_v12 }
0x1885   :  { %v2858_v13 = vpop.eup %2857 }
0x18ec   :  { %v1959_v52 = vpop.permute.xlu1 %1958 }
0x18ed   :  { %v1961_v9 = vadd.f32 %v1959_v52, %v1955_v36 }
0x18ef   :  { %2859 = vtanh.f32 %v1961_v9 }
0x18f9   :  { %v2860_v54 = vpop.eup %2859 }
0x18fa   :  { %v1963_v58 = vmul.f32 %v2860_v54, %v2858_v13 }
0x18fc   :  { %1973 = vrot.lane.b32.xlu0 %v1963_v58, %s3023_s1 }
0x196e   :  { %v1974_v26 = vpop.permute.xlu0 %1973 }
0x196f   :  { %2403 = vmatmul.mubr.msk.f32.vlgmr.msra.gmra.mrb[16].mxu1 %vm257_vm5, %v1974_v26 }
0x1970   :  { %2681 = vmatpush1.bf16.msra.mxu1 %v3367_v4  ;;  %2277 = vmatprep.mubr.f32.mxu1 %v3022_v1 }
0x1971   :  { %2683 = vmatprep.subr.bf16.mxu1 %v3376_v7 }
0x1974   :  { %2685 = vmatpush1.bf16.msra.mxu1 %v3378_v10 }
0x1975   :  { %2687 = vmatprep.subr.bf16.mxu1 %v3380_v11 }
0x1978   :  { %2689 = vmatpush1.bf16.msra.mxu1 %v3384_v18  ;;  %v2070_v18 = vrot.slane %v1961_v9, 6 }
0x1979   :  { %2691 = vmatprep.subr.bf16.mxu1 %v3387_v19 }
0x197c   :  { %2693 = vmatpush1.bf16.msra.mxu1 %v3390_v25 }
0x1a42   :  { %v2043_v28 = vpop.f32.mrb[16].mxu1 }
0x1a43   :  { %v2050_v30 = vrot.slane %v2043_v28, 6  ;;  %v2045_v50 = vpop.f32.mrb[17].mxu1 }
0x1a44   :  { %v2051_v8 = vrot.slane %v2045_v50, 6 }
0x1a45   :  { %v2054_v4 = vadd.f32 %v2050_v30, %v3443_v23 }
0x1a46   :  { %v2055_v1 = vadd.f32 %v2051_v8, %v3477_v14 }
0x1a47   :  { %v2404_v31 = vmul.f32 -1.442695, %v2054_v4 }
0x1a48   :  { %v2405_v25 = vmul.f32 -1.442695, %v2055_v1 }
0x1a49   :  { %2861 = vpow2.f32 %v2404_v31 }
0x1a4a   :  { %2863 = vtanh.f32 %v2055_v1 }
0x1a53   :  { %v2862_v7 = vpop.eup %2861 }
0x1a54   :  { %v2062_v10 = vadd.f32 1.0, %v2862_v7  ;;  %v2864_v11 = vpop.eup %2863 }
0x1a56   :  { %2865 = vrcp.f32 %v2062_v10 }
0x1a57   :  { %2867 = vpow2.f32 %v2405_v25 }
0x1a60   :  { %v2866_v33 = vpop.eup %2865 }
0x1a61   :  { %v2073_v19 = vmul.f32 %v2866_v33, %v2864_v11  ;;  %v2072_v35 = vmul.f32 %v2866_v33, %v2070_v18  ;;  %v2868_v63 = vpop.eup %2867 }
0x1a62   :  { %v2063_v37 = vadd.f32 1.0, %v2868_v63  ;;  %v2413_v63 = vld [vmem:[#allocation4] ss:$0 sm:$0xff] }
0x1a63   :  { %2075 = vrot.lane.b32.xlu1 %v2073_v19, %s3023_s1 }
0x1a64   :  { %2869 = vrcp.f32 %v2063_v37 }
0x1a6e   :  { %v2870_v14 = vpop.eup %2869 }
0x1ad5   :  { %v2076_v23 = vpop.permute.xlu1 %2075 }
0x1ad6   :  { %v2078_v38 = vadd.f32 %v2076_v23, %v2072_v35 }
0x1ad8   :  { %2871 = vtanh.f32 %v2078_v38  ;;  %v2188_v59 = vrot.slane %v2078_v38, 6 }
0x1ae2   :  { %v2872_v2 = vpop.eup %2871 }
0x1ae3   :  { %v2080_v40 = vmul.f32 %v2872_v2, %v2870_v14 }
0x1ae5   :  { %v2090_v24 = vrot.slane %v2080_v40, 2 }
0x1ae7   :  { %2091 = vrot.lane.b32.xlu0 %v2090_v24, %s3023_s1 }
0x1b59   :  { %v2092_v41 = vpop.permute.xlu0 %2091 }
0x1b5a   :  { %2406 = vmatmul.mubr.msk.f32.vlgmr.msra.gmra.mrb[18].mxu0 %vm257_vm5, %v2092_v41 }
0x1c2d   :  { %v2161_v43 = vpop.f32.mrb[18].mxu0 }
0x1c2e   :  { %v2168_v46 = vrot.slane %v2161_v43, 4  ;;  %v2163_v61 = vpop.f32.mrb[19].mxu0 }
0x1c2f   :  { %v2169_v57 = vrot.slane %v2163_v61, 4 }
0x1c30   :  { %v2172_v47 = vadd.f32 %v2168_v46, %v3448_v60 }
0x1c31   :  { %v2173_v3 = vadd.f32 %v2169_v57, %v3481_v15 }
0x1c32   :  { %v2407_v48 = vmul.f32 -1.442695, %v2172_v47 }
0x1c33   :  { %v2408_v53 = vmul.f32 -1.442695, %v2173_v3 }
0x1c34   :  { %2873 = vpow2.f32 %v2407_v48 }
0x1c35   :  { %2875 = vtanh.f32 %v2173_v3 }
0x1c3e   :  { %v2874_v49 = vpop.eup %2873 }
0x1c3f   :  { %v2180_v32 = vadd.f32 1.0, %v2874_v49  ;;  %v2876_v6 = vpop.eup %2875 }
0x1c41   :  { %2877 = vrcp.f32 %v2180_v32 }
0x1c42   :  { %2879 = vpow2.f32 %v2408_v53 }
0x1c4b   :  { %v2878_v45 = vpop.eup %2877 }
0x1c4c   :  { %v2191_v42 = vmul.f32 %v2878_v45, %v2876_v6  ;;  %v2190_v44 = vmul.f32 %v2878_v45, %v2188_v59  ;;  %v2880_v56 = vpop.eup %2879 }
0x1c4d   :  { %v2181_v62 = vadd.f32 1.0, %v2880_v56 }
0x1c4e   :  { %2193 = vrot.lane.b32.xlu1 %v2191_v42, %s3023_s1 }
0x1c4f   :  { %2881 = vrcp.f32 %v2181_v62 }
0x1c59   :  { %v2882_v15 = vpop.eup %2881 }
0x1cc0   :  { %v2194_v60 = vpop.permute.xlu1 %2193 }
0x1cc1   :  { %v2196_v55 = vadd.f32 %v2194_v60, %v2190_v44 }
0x1cc3   :  { %2883 = vtanh.f32 %v2196_v55  ;;  %v2306_v58 = vrot.slane %v2196_v55, 6 }
0x1ccd   :  { %v2884_v17 = vpop.eup %2883 }
0x1cce   :  { %v2198_v20 = vmul.f32 %v2884_v17, %v2882_v15 }
0x1cd0   :  { %v2208_v27 = vrot.slane %v2198_v20, 4 }
0x1cd2   :  { %2209 = vrot.lane.b32.xlu0 %v2208_v27, %s3023_s1 }
0x1cd6   :  { %2323 = vrot.lane.b32.xlu0 %v2412_v16, %s3023_s1 }
0x1d44   :  { %v2210_v51 = vpop.permute.xlu0 %2209 }
0x1d45   :  { %2409 = vmatmul.mubr.msk.f32.vlgmr.msra.gmra.mrb[18].mxu1 %vm257_vm5, %v2210_v51 }
0x1d48   :  { %v2324_v50 = vpop.permute.xlu0 %2323 }
0x1d49   :  { %v2326_v8 = vmul.f32 %v2324_v50, %v3369_v34 }
0x1e18   :  { %v2279_v29 = vpop.f32.mrb[18].mxu1 }
0x1e19   :  { %v2286_v0 = vrot.slane %v2279_v29, 2  ;;  %v2281_v36 = vpop.f32.mrb[19].mxu1 }
0x1e1a   :  { %v2287_v39 = vrot.slane %v2281_v36, 2 }
0x1e1b   :  { %v2290_v5 = vadd.f32 %v2286_v0, %v3485_v21 }
0x1e1c   :  { %v2291_v12 = vadd.f32 %v2287_v39, %v3489_v22 }
0x1e1d   :  { %v2410_v52 = vmul.f32 -1.442695, %v2290_v5 }
0x1e1e   :  { %v2411_v21 = vmul.f32 -1.442695, %v2291_v12 }
0x1e1f   :  { %2885 = vpow2.f32 %v2410_v52 }
0x1e20   :  { %2887 = vtanh.f32 %v2291_v12 }
0x1e29   :  { %v2886_v9 = vpop.eup %2885 }
0x1e2a   :  { %v2298_v13 = vadd.f32 1.0, %v2886_v9  ;;  %v2888_v54 = vpop.eup %2887 }
0x1e2c   :  { %2889 = vrcp.f32 %v2298_v13 }
0x1e2d   :  { %2891 = vpow2.f32 %v2411_v21 }
0x1e36   :  { %v2890_v26 = vpop.eup %2889 }
0x1e37   :  { %v2309_v28 = vmul.f32 %v2890_v26, %v2888_v54  ;;  %v2308_v30 = vmul.f32 %v2890_v26, %v2306_v58  ;;  %v2892_v22 = vpop.eup %2891 }
0x1e38   :  { %v2299_v4 = vadd.f32 1.0, %v2892_v22 }
0x1e39   :  { %2311 = vrot.lane.b32.xlu1 %v2309_v28, %s3023_s1 }
0x1e3a   :  { %2893 = vrcp.f32 %v2299_v4 }
0x1e3d   :  { %2328 = vrot.lane.b32.xlu1 %v2326_v8, %s3023_s1 }
0x1e44   :  { %v2894_v11 = vpop.eup %2893 }
0x1eab   :  { %v2312_v1 = vpop.permute.xlu1 %2311 }
0x1eac   :  { %v2314_v31 = vadd.f32 %v2312_v1, %v2308_v30 }
0x1eae   :  { %2895 = vtanh.f32 %v2314_v31 }
0x1eaf   :  { %v2329_v7 = vpop.permute.xlu1 %2328 }
0x1eb0   :  { %v2332_v10 = vsel %vm2331_vm12, %v2329_v7, 0.0 }
0x1eb1   :  { %2333 = vadd.xlane.f32.xlu1 %v2332_v10 }
0x1eb8   :  { %v2896_v18 = vpop.eup %2895 }
0x1eb9   :  { %v2316_v33 = vmul.f32 %v2896_v18, %v2894_v11 }
0x1ebb   :  { %v2336_v19 = vmul.f32 %v2412_v16, %v2316_v33 }
0x1ebd   :  { %2338 = vrot.lane.b32.xlu0 %v2336_v19, %s3023_s1 }
0x1f2f   :  { %v2339_v34 = vpop.permute.xlu0 %2338 }
0x1f30   :  { %v2341_v35 = vsel %vm2331_vm12, %v2339_v34, 0.0 }
0x1f31   :  { %2342 = vadd.xlane.f32.xlu0 %v2341_v35 }
0x1f3e   :  { %v2334_v25 = vpop.xlane.xlu1 %2333 }
0x1fbe   :  { %v2343_v37 = vpop.xlane.xlu0 %2342 }
0x1fbf   :  { %v2344_v23 = vadd.f32 %v2343_v37, %v2334_v25 }
0x1fc1   :  { %v2352_v38 = vadd.f32 %v2413_v63, %v2344_v23 }
0x1fc3   :  { %2354 = vst.msk [vmem:[%s3609_s10 - $0x6] sm:$0xc0] %vm2353_vm13, %v2352_v38 }
0x1fc4   :  { %2359 = vsyncpa [#allocation6], 1 }
0x1fc5   :  { %2360 = vsyncpa [#allocation8], 1 }
0x1fc6   :  { %2361 = vsyncpa [#allocation11], 1 }

</bundles_post_ra>
